<compile_context>
chip_gen: v7x
topology: tpu7x:2x2x1
jax: 0.10.0
libtpu: 0.0.40
codegen_flags: <defaults>
</compile_context>

<pallas_src>
import functools

import jax
import jax.numpy as jnp
from jax.experimental import pallas as pl
from jax.experimental.pallas import tpu as pltpu

F32 = jnp.float32
SMEM = pltpu.MemorySpace.SMEM

# Large finite negative instead of -inf for masked scores: avoids the
# exp(-inf - (-inf)) NaN hazard; fully masked rows degrade to (near-)uniform
# attention instead of NaN.  Returned scores hold ~-1e30 instead of -inf.
MASK_NEG = -1e30

MAX_REL_POS = 10
NUM_REL_BUCKETS = 2 * MAX_REL_POS + 1
NODE_TYPE_TO_IDX = {0: 0, 1: 1}
HYPER_TYPE_TO_IDX = {0: 0, 2: 1, 3: 2, 4: 3}

# MXU operand dtype (bf16 operands, f32 accumulation).  Elementwise math is
# kept in f32 so this is safe on v5e (no bf16 VPU/EUP) as well.
MXU_DTYPE = jnp.bfloat16

# Cross-generation scoped-VMEM budget (above default limits, < v7x 64 MiB).
VMEM_LIMIT_BYTES = 48 * 1024 * 1024

# Production-scale tile targets; the toy test uses full extents (grid=(1,1)).
Q_TILE = 256
K_TILE = 512
ADJ_ROW_TILE = 256


def _pick_row_tile(n, target):
    """Largest multiple-of-8 divisor of n that is <= target, else n."""
    if n <= target:
        return n
    for t in range(min(target, n), 7, -1):
        if n % t == 0 and t % 8 == 0:
            return t
    return n


def _pick_key_tile(n, target):
    """Largest multiple-of-128 divisor of n that is <= target, else n."""
    if n <= target:
        return n
    t = (min(target, n) // 128) * 128
    while t >= 128:
        if n % t == 0:
            return t
        t -= 128
    return n


# ----------------------------------------------------------------------------
# Pallas kernels
# ----------------------------------------------------------------------------


def _ma_flash_kernel(num_heads, head_dim, n_q_types, n_kv_types, inv_scale,
                     with_scores,
                     qf_ref, kvf_ref, qoh_ref, kvoh_ref, mask_ref,
                     qg_ref, qb_ref, kvg_ref, kvb_ref,
                     wq_ref, wkv_ref, wout_ref, bout_ref, relpos_ref,
                     out_ref, *rest):
    """Fused IntraMA/InterMA block, flash-style over kv tiles."""
    if with_scores:
        scores_ref = rest[0]
        qn_s, q_s, m_s, l_s, acc_s = rest[1:]
    else:
        scores_ref = None
        qn_s, q_s, m_s, l_s, acc_s = rest

    qi = pl.program_id(0)
    ki = pl.program_id(1)
    last_k = pl.num_programs(1) - 1
    tq, din = qf_ref.shape
    tk = kvf_ref.shape[0]
    hd = head_dim
    hdim = num_heads * head_dim

    def layer_norm(x, g, b):
        mu = jnp.mean(x, axis=-1, keepdims=True)
        var = jnp.mean((x - mu) ** 2, axis=-1, keepdims=True)
        return (x - mu) * jax.lax.rsqrt(var + 1e-5) * g + b

    def typed_expand(x, oh, n_types):
        # Per-row typed Linear as ONE wide-contraction matmul operand:
        #   [oh[:,0]*x | oh[:,1]*x | ...]  @  [W_0; W_1; ...]
        return jnp.concatenate([oh[:, t:t + 1] * x for t in range(n_types)],
                               axis=-1)

    # ---- init: once per q tile (first kv step): LN + typed Q projection ----
    @pl.when(ki == 0)
    def _init():
        qn = layer_norm(qf_ref[...], qg_ref[...], qb_ref[...])
        qe = typed_expand(qn, qoh_ref[...], n_q_types)
        q = jnp.dot(qe.astype(MXU_DTYPE), wq_ref[...].astype(MXU_DTYPE),
                    preferred_element_type=F32) * inv_scale   # scale folded in
        qn_s[...] = qn
        for h in range(num_heads):
            q_s[h] = q[:, h * hd:(h + 1) * hd].astype(MXU_DTYPE)
        m_s[...] = jnp.full_like(m_s, -jnp.inf)
        l_s[...] = jnp.zeros_like(l_s)
        acc_s[...] = jnp.zeros_like(acc_s)

    # ---- every (q tile, kv tile) step: LN + fused typed K|V projection ----
    kvn = layer_norm(kvf_ref[...], kvg_ref[...], kvb_ref[...])
    kve = typed_expand(kvn, kvoh_ref[...], n_kv_types)
    kv = jnp.dot(kve.astype(MXU_DTYPE), wkv_ref[...].astype(MXU_DTYPE),
                 preferred_element_type=F32)                  # (tk, 2*H*hd)

    # Additive bias built in-kernel: mask==0 -> MASK_NEG, plus rel-pos
    # embedding via a 21-way select from the tiny SMEM table (no (H,Nq,Nk)
    # HBM slab).
    mask_bias = jnp.where(mask_ref[...] == 0.0, jnp.float32(MASK_NEG),
                          jnp.float32(0.0))                   # (tq, tk)
    q_ids = qi * tq + jax.lax.broadcasted_iota(jnp.int32, (tq, tk), 0)
    k_ids = ki * tk + jax.lax.broadcasted_iota(jnp.int32, (tq, tk), 1)
    r = jnp.clip(q_ids - k_ids, -MAX_REL_POS, MAX_REL_POS) + MAX_REL_POS
    bias = [mask_bias] * num_heads
    for b in range(NUM_REL_BUCKETS):
        m_b = (r == b).astype(F32)                            # shared cmp
        for h in range(num_heads):
            bias[h] = bias[h] + m_b * relpos_ref[b, h]        # SMEM scalar

    # ---- per-head online softmax accumulation over kv tiles ----
    for h in range(num_heads):
        k_h = kv[:, h * hd:(h + 1) * hd]
        v_h = kv[:, hdim + h * hd: hdim + (h + 1) * hd]
        s = jnp.einsum('qd,kd->qk', q_s[h], k_h.astype(MXU_DTYPE),
                       preferred_element_type=F32)            # (tq, tk)
        s = s + bias[h]
        if with_scores:
            scores_ref[h] = s                                 # pre-softmax
        m_prev = m_s[h]
        m_new = jnp.maximum(m_prev, jnp.max(s, axis=-1, keepdims=True))
        alpha = jnp.exp(m_prev - m_new)
        p = jnp.exp(s - m_new)
        l_s[h] = alpha * l_s[h] + jnp.sum(p, axis=-1, keepdims=True)
        acc_s[h] = alpha * acc_s[h] + jnp.dot(p.astype(MXU_DTYPE),
                                              v_h.astype(MXU_DTYPE),
                                              preferred_element_type=F32)
        m_s[h] = m_new

    # ---- finalize: normalize, SiLU, to_out as per-head stacked matmuls ----
    @pl.when(ki == last_k)
    def _finalize():
        out = jnp.dot(qn_s[...].astype(MXU_DTYPE),
                      wout_ref[:din, :].astype(MXU_DTYPE),
                      preferred_element_type=F32) + bout_ref[...]
        for h in range(num_heads):
            att_h = acc_s[h] / l_s[h]                         # exact divide
            att_h = att_h * jax.nn.sigmoid(att_h)             # SiLU (EUP)
            w_h = wout_ref[din + h * hd: din + (h + 1) * hd, :]
            out = out + jnp.dot(att_h.astype(MXU_DTYPE), w_h.astype(MXU_DTYPE),
                                preferred_element_type=F32)
        out_ref[...] = out


def _dyn_adj_kernel(hidden, static_ref, emb_row_ref, emb_all_ref,
                    w1_ref, b1_ref, w2_ref, b2_ref, o_ref):
    """Row tile of: sim = E@E.T, gate MLP (2->hidden->1), gated blend + mask."""
    st = static_ref[...]                                      # (tr, N)
    sim = jnp.einsum('rd,nd->rn', emb_row_ref[...].astype(MXU_DTYPE),
                     emb_all_ref[...].astype(MXU_DTYPE),
                     preferred_element_type=F32)              # (tr, N)
    # Accumulate over the hidden axis: only a couple of (tr, N) slabs live
    # instead of a (hidden, N, N) intermediate.
    acc = jnp.full_like(st, b2_ref[0])
    for j in range(hidden):
        h_j = jnp.maximum(st * w1_ref[j, 0] + sim * w1_ref[j, 1] + b1_ref[j],
                          0.0)
        acc = acc + h_j * w2_ref[j]
    gate = jax.nn.sigmoid(acc)
    dyn = gate * st + (1.0 - gate) * sim
    o_ref[...] = jnp.where(st != 0.0, dyn, 0.0)


# ----------------------------------------------------------------------------
# Kernel wrappers
# ----------------------------------------------------------------------------


def ma_forward(p, q_feats, kv_feats, mask, q_onehot, kv_onehot, num_heads,
               head_dim, *, with_scores=True):
    """One gridded pallas_call for an IntraMA / InterMA block."""
    nq, din = q_feats.shape
    nk = kv_feats.shape[0]
    n_q_types = q_onehot.shape[1]
    n_kv_types = kv_onehot.shape[1]
    tq = _pick_row_tile(nq, Q_TILE)
    tk = _pick_key_tile(nk, K_TILE)
    grid = (nq // tq, nk // tk)
    inv_scale = 1.0 / (float(head_dim) ** 0.5)

    kernel = functools.partial(_ma_flash_kernel, num_heads, head_dim,
                               n_q_types, n_kv_types, inv_scale, with_scores)

    def full2d(arr):
        return pl.BlockSpec(arr.shape, lambda qi, ki: (0, 0))

    in_specs = [
        pl.BlockSpec((tq, din), lambda qi, ki: (qi, 0)),          # q feats
        pl.BlockSpec((tk, din), lambda qi, ki: (ki, 0)),          # kv feats
        pl.BlockSpec((tq, n_q_types), lambda qi, ki: (qi, 0)),    # q one-hot
        pl.BlockSpec((tk, n_kv_types), lambda qi, ki: (ki, 0)),   # kv one-hot
        pl.BlockSpec((tq, tk), lambda qi, ki: (qi, ki)),          # mask tile
        full2d(p['q_norm_g']), full2d(p['q_norm_b']),
        full2d(p['kv_norm_g']), full2d(p['kv_norm_b']),
        full2d(p['q_w']), full2d(p['kv_w']),
        full2d(p['w_out']), full2d(p['b_out']),
        pl.BlockSpec(memory_space=SMEM),                          # rel-pos tbl
    ]

    out_shape = jax.ShapeDtypeStruct((nq, din), F32)
    out_specs = pl.BlockSpec((tq, din), lambda qi, ki: (qi, 0))
    if with_scores:
        out_shape = (out_shape,
                     jax.ShapeDtypeStruct((num_heads, nq, nk), F32))
        out_specs = (out_specs,
                     pl.BlockSpec((num_heads, tq, tk),
                                  lambda qi, ki: (0, qi, ki)))

    scratch_shapes = [
        pltpu.VMEM((tq, din), F32),                        # normed q features
        pltpu.VMEM((num_heads, tq, head_dim), MXU_DTYPE),  # per-head scaled Q
        pltpu.VMEM((num_heads, tq, 1), F32),               # running max
        pltpu.VMEM((num_heads, tq, 1), F32),               # running denom
        pltpu.VMEM((num_heads, tq, head_dim), F32),        # running acc
    ]

    res = pl.pallas_call(
        kernel,
        out_shape=out_shape,
        grid=grid,
        in_specs=in_specs,
        out_specs=out_specs,
        scratch_shapes=scratch_shapes,
        compiler_params=pltpu.CompilerParams(
            dimension_semantics=("parallel", "arbitrary"),
            vmem_limit_bytes=VMEM_LIMIT_BYTES),
    )(q_feats.astype(F32), kv_feats.astype(F32), q_onehot, kv_onehot,
      mask.astype(F32),
      p['q_norm_g'], p['q_norm_b'], p['kv_norm_g'], p['kv_norm_b'],
      p['q_w'], p['kv_w'], p['w_out'], p['b_out'], p['rel_pos_emb'])
    if with_scores:
        return res
    return res, None


def compute_dynamic_adjacency(static_adj, node_emb, gate_params):
    w1, b1, w2, b2 = gate_params                   # (32,2),(32,),(1,32),(1,)
    n, m = static_adj.shape
    # TODO(synk): interpolate branch (sim size != adj size) not implemented.
    assert n == m and node_emb.shape[0] == n
    din = node_emb.shape[1]
    hidden = w1.shape[0]
    tr = _pick_row_tile(n, ADJ_ROW_TILE)
    grid = (n // tr,)
    emb = node_emb.astype(F32)
    kernel = functools.partial(_dyn_adj_kernel, hidden)
    return pl.pallas_call(
        kernel,
        out_shape=jax.ShapeDtypeStruct((n, n), F32),
        grid=grid,
        in_specs=[
            pl.BlockSpec((tr, n), lambda i: (i, 0)),       # static row tile
            pl.BlockSpec((tr, din), lambda i: (i, 0)),     # emb row tile
            pl.BlockSpec((n, din), lambda i: (0, 0)),      # full emb (sim)
            pl.BlockSpec(memory_space=SMEM),               # w1 (hidden, 2)
            pl.BlockSpec(memory_space=SMEM),               # b1 (hidden,)
            pl.BlockSpec(memory_space=SMEM),               # w2 (hidden,)
            pl.BlockSpec(memory_space=SMEM),               # b2 (1,)
        ],
        out_specs=pl.BlockSpec((tr, n), lambda i: (i, 0)),
        compiler_params=pltpu.CompilerParams(
            dimension_semantics=("parallel",),
            vmem_limit_bytes=VMEM_LIMIT_BYTES),
    )(static_adj.astype(F32), emb, emb, w1, b1, w2.reshape(-1), b2)


# ----------------------------------------------------------------------------
# Model glue (plain JAX)
# ----------------------------------------------------------------------------


def make_onehot(types, mapping):
    idx = jnp.array([mapping[t] for t in types], jnp.int32)
    return jax.nn.one_hot(idx, len(mapping), dtype=F32)


def meta_hgt_forward(params, hyper_feat, node_feat, incidence, node_types,
                     hyper_types, num_heads, head_dim):
    node_oh = make_onehot(node_types, NODE_TYPE_TO_IDX)
    hyper_oh = make_onehot(hyper_types, HYPER_TYPE_TO_IDX)
    # IntraMA: queries = hyperedges, keys/values = nodes, mask = incidence.T
    upd_hyper, s_intra = ma_forward(params['intra'], hyper_feat, node_feat,
                                    incidence.T, hyper_oh, node_oh,
                                    num_heads, head_dim)
    # InterMA: queries = nodes, keys/values = updated hyperedges, mask = inc.
    upd_node, s_inter = ma_forward(params['inter'], node_feat, upd_hyper,
                                   incidence, node_oh, hyper_oh,
                                   num_heads, head_dim)
    return upd_hyper, upd_node, {'Intra': s_intra, 'Inter': s_inter}


def semantic_forward(weight, node_emb, edge_emb, n_genes, node_list,
                     genes_list):
    din = node_emb.shape[1]
    emb1 = jnp.zeros((n_genes, din), F32).at[jnp.array(node_list)].set(node_emb)
    emb2 = jnp.zeros((n_genes, din), F32).at[jnp.array(genes_list)].set(edge_emb)
    rep = jnp.stack([jnp.mean(emb1, axis=0), jnp.mean(emb2, axis=0)], axis=1)
    scores = weight @ rep                                     # (2,)
    attn = jax.nn.softmax(scores, axis=-1)
    out = attn[0] * emb1 + attn[1] * emb2
    return out, scores


def gen_geneflow(params, lists, types_arr, emb, gene_inc, num_heads, head_dim):
    node_list = lists['gene_node_list']
    hyper_list = lists['gene_hyperedge_list']
    node_feat = emb[jnp.array(node_list)]
    hyper_feat = emb[jnp.array(hyper_list)]
    init_gene = emb[jnp.array(lists['all_genes'])]
    node_types = [types_arr[i] for i in node_list]
    hyper_types = [types_arr[i] for i in hyper_list]
    upd_hyper, upd_node, scores = meta_hgt_forward(
        params['metaHGT_g'], hyper_feat, node_feat, gene_inc,
        node_types, hyper_types, num_heads, head_dim)
    emb = emb.at[jnp.array(hyper_list)].set(upd_hyper)
    gene_hyper_emb = emb[jnp.array(lists['genes_in'])]
    gene_expr, sem_score = semantic_forward(
        params['semantic_weight'], upd_node, gene_hyper_emb,
        len(lists['all_genes']), node_list, lists['genes_in'])
    scores['semantic'] = sem_score
    gene_expr = gene_expr + init_gene
    return emb, gene_expr, scores


def gen_diseaseflow(params, lists, types_arr, emb, gene_expr, dis_inc,
                    num_heads, head_dim):
    emb = emb.at[jnp.array(lists['all_genes'])].set(gene_expr)
    node_list = lists['diseaseid_list']
    hyper_list = lists['hpo_do_gene_all_keys']
    node_feat = emb[jnp.array(node_list)]
    hyper_feat = emb[jnp.array(hyper_list)]
    init_dis = emb[jnp.array(node_list)]
    node_types = [types_arr[i] for i in node_list]
    hyper_types = [types_arr[i] for i in hyper_list]
    upd_hyper, upd_node, scores = meta_hgt_forward(
        params['metaHGT_d'], hyper_feat, node_feat, dis_inc,
        node_types, hyper_types, num_heads, head_dim)
    dis_expr = upd_node + init_dis
    return emb, upd_hyper, dis_expr, scores


def hit_forward(params, lists, types_arr, gene_inc, dis_inc, num_heads,
                head_dim):
    scores_attention = {}
    emb = params['embeddings']
    gene_inc = gene_inc.astype(F32)
    dis_inc = dis_inc.astype(F32)
    gene_dyn = compute_dynamic_adjacency(
        gene_inc, emb[jnp.array(lists['gene_node_list'])], params['gate'])
    dis_dyn = compute_dynamic_adjacency(
        dis_inc, emb[jnp.array(lists['diseaseid_list'])], params['gate'])
    alpha, beta = params['dynamic_alpha'], params['dynamic_beta']
    emb, gene_expr, s_gene = gen_geneflow(
        params, lists, types_arr, emb,
        alpha * gene_inc + (1.0 - alpha) * gene_dyn, num_heads, head_dim)
    scores_attention['gene'] = s_gene
    emb, dis_hyper, dis_expr, s_dis = gen_diseaseflow(
        params, lists, types_arr, emb, gene_expr,
        beta * dis_inc + (1.0 - beta) * dis_dyn, num_heads, head_dim)
    scores_attention['disease'] = s_dis
    emb = emb.at[jnp.array(lists['hpo_do_gene_all_keys'])].set(dis_hyper)
    emb = emb.at[jnp.array(lists['diseaseid_list'])].set(dis_expr)
    return emb, scores_attention


# ----------------------------------------------------------------------------
# Deterministic parameter init
# ----------------------------------------------------------------------------


def init_ma_params(key, input_dim, emb_dim, num_heads, n_q_types, n_kv_types):
    hd = emb_dim * num_heads
    ks = jax.random.split(key, 6)
    to_out_w = jax.random.normal(ks[3], (input_dim, input_dim + hd), F32) * 0.05
    k_w = (jax.random.normal(ks[1], (n_kv_types, input_dim, hd), F32) * 0.05
           ).reshape(n_kv_types * input_dim, hd)
    v_w = (jax.random.normal(ks[2], (n_kv_types, input_dim, hd), F32) * 0.05
           ).reshape(n_kv_types * input_dim, hd)
    return dict(
        q_w=(jax.random.normal(ks[0], (n_q_types, input_dim, hd), F32) * 0.05
             ).reshape(n_q_types * input_dim, hd),
        kv_w=jnp.concatenate([k_w, v_w], axis=-1),     # fused K|V bank
        w_out=to_out_w.T,                              # (Din + H*hd, Din)
        b_out=(jax.random.normal(ks[4], (input_dim,), F32) * 0.05
               ).reshape(1, -1),
        q_norm_g=jnp.ones((1, input_dim), F32),
        q_norm_b=jnp.zeros((1, input_dim), F32),
        kv_norm_g=jnp.ones((1, input_dim), F32),
        kv_norm_b=jnp.zeros((1, input_dim), F32),
        rel_pos_emb=jax.random.normal(ks[5], (NUM_REL_BUCKETS, num_heads), F32),
    )


def init_params(key, input_dim, emb_dim, num_heads, total):
    ks = jax.random.split(key, 10)
    return {
        'embeddings': jax.random.normal(ks[0], (total, input_dim), F32),
        'metaHGT_g': {
            'intra': init_ma_params(ks[1], input_dim, emb_dim, num_heads, 4, 2),
            'inter': init_ma_params(ks[2], input_dim, emb_dim, num_heads, 2, 4),
        },
        'metaHGT_d': {
            'intra': init_ma_params(ks[3], input_dim, emb_dim, num_heads, 4, 2),
            'inter': init_ma_params(ks[4], input_dim, emb_dim, num_heads, 2, 4),
        },
        'semantic_weight': jax.random.normal(ks[5], (input_dim,), F32) * 0.01,
        'dynamic_alpha': jnp.float32(0.5),
        'dynamic_beta': jnp.float32(0.5),
        'gate': (jax.random.normal(ks[6], (32, 2), F32) * 0.05,
                 jax.random.normal(ks[7], (32,), F32) * 0.05,
                 jax.random.normal(ks[8], (1, 32), F32) * 0.05,
                 jax.random.normal(ks[9], (1,), F32) * 0.05),
    }


# ----------------------------------------------------------------------------
# Test driver
# ----------------------------------------------------------------------------

if __name__ == "__main__":
    input_dim, embedding_dim, num_heads = 32, 8, 4
    TOTAL = 64                              # scaled-down stand-in for 62071

    # scaled-down version of the hard-coded 62071-entry type thresholds
    types_arr = []
    for i in range(TOTAL):
        if i <= 15:
            types_arr.append(0)
        elif i <= 23:
            types_arr.append(2)
        elif i <= 31:
            types_arr.append(1)
        elif i <= 39:
            types_arr.append(3)
        elif i <= 47:
            types_arr.append(4)
        else:
            types_arr.append(0)

    lists = {
        'all_genes': list(range(16)),                            # type 0
        'gene_node_list': [0, 1, 2, 3, 4, 5, 6, 7],              # node type 0
        'gene_hyperedge_list': [8, 9, 16, 17, 32, 33, 40, 41],   # types 0,2,3,4
        'diseaseid_list': [48, 49, 50, 51, 24, 25, 26, 27],      # node 0,1
        'hpo_do_gene_all_keys': [10, 11, 18, 19, 34, 35, 42, 43],  # 0,2,3,4
    }
    lists['genes_in'] = sorted(set(lists['all_genes'])
                               & set(lists['gene_hyperedge_list']))

    key = jax.random.PRNGKey(0)
    kp, kg, kd = jax.random.split(key, 3)
    params = init_params(kp, input_dim, embedding_dim, num_heads, TOTAL)

    # incidence matrices: square, diag guarantees every attention row has at
    # least one unmasked key.
    n_gene = len(lists['gene_node_list'])
    n_dis = len(lists['diseaseid_list'])
    gene_inc = jnp.maximum(jnp.eye(n_gene, dtype=F32),
                           (jax.random.uniform(kg, (n_gene, n_gene)) < 0.35
                            ).astype(F32))
    dis_inc = jnp.maximum(jnp.eye(n_dis, dtype=F32),
                          (jax.random.uniform(kd, (n_dis, n_dis)) < 0.35
                           ).astype(F32))

    emb_out, scores = hit_forward(params, lists, types_arr, gene_inc, dis_inc,
                                  num_heads, embedding_dim)
    emb_out = jax.block_until_ready(emb_out)
    assert emb_out.shape == (TOTAL, input_dim)
    assert bool(jnp.all(jnp.isfinite(emb_out)))
    assert scores['gene']['Intra'].shape == (num_heads, n_gene, n_gene)
    print("KERNEL_OK")
</pallas_src>

<mosaic_0001>
module attributes {stable_mosaic.version = 11 : i64} {
  func.func @_dyn_adj_kernel(%arg0: i32, %arg1: memref<8x8xf32, #tpu.memory_space<vmem>>, %arg2: memref<8x32xf32, #tpu.memory_space<vmem>>, %arg3: memref<8x32xf32, #tpu.memory_space<vmem>>, %arg4: memref<32x2xf32, #tpu.memory_space<smem>>, %arg5: memref<32xf32, #tpu.memory_space<smem>>, %arg6: memref<32xf32, #tpu.memory_space<smem>>, %arg7: memref<1xf32, #tpu.memory_space<smem>>, %arg8: memref<8x8xf32, #tpu.memory_space<vmem>>) attributes {dimension_semantics = [#tpu.dimension_semantics<parallel>], iteration_bounds = array<i64: 1>, scalar_prefetch = 0 : i64, scratch_operands = 0 : i64, tpu.core_type = #tpu.core_type<tc>, window_params = [{transform_indices = @transform_0, window_bounds = array<i64: 8, 8>}, {transform_indices = @transform_1, window_bounds = array<i64: 8, 32>}, {pipeline_mode = #tpu.pipeline_mode<synchronous>, transform_indices = @transform_2, window_bounds = array<i64: 8, 32>}, {transform_indices = @transform_3, window_bounds = array<i64: 32, 2>}, {transform_indices = @transform_4, window_bounds = array<i64: 32>}, {transform_indices = @transform_5, window_bounds = array<i64: 32>}, {transform_indices = @transform_6, window_bounds = array<i64: 1>}, {transform_indices = @transform_7, window_bounds = array<i64: 8, 8>}]} {
    %c0 = arith.constant 0 : index
    %c0_0 = arith.constant 0 : index
    %0 = vector.load %arg1[%c0, %c0_0] : memref<8x8xf32, #tpu.memory_space<vmem>>, vector<8x8xf32>
    %c0_1 = arith.constant 0 : index
    %c0_2 = arith.constant 0 : index
    %1 = vector.load %arg2[%c0_1, %c0_2] : memref<8x32xf32, #tpu.memory_space<vmem>>, vector<8x32xf32>
    %2 = arith.truncf %1 : vector<8x32xf32> to vector<8x32xbf16>
    %c0_3 = arith.constant 0 : index
    %c0_4 = arith.constant 0 : index
    %3 = vector.load %arg3[%c0_3, %c0_4] : memref<8x32xf32, #tpu.memory_space<vmem>>, vector<8x32xf32>
    %4 = arith.truncf %3 : vector<8x32xf32> to vector<8x32xbf16>
    "tpu.trace_start"() <{level = 10 : i32, message = "rd,nd->rn"}> : () -> ()
    %cst = arith.constant dense<0.000000e+00> : vector<8x8xf32>
    %5 = tpu.matmul %2, %4, %cst {dimension_numbers = #tpu.dot_dimension_numbers<[1], [1], [0], [0], [0, 0, 1, 0], [], []>} : vector<8x32xbf16>, vector<8x32xbf16>, vector<8x8xf32> -> vector<8x8xf32>
    "tpu.trace_stop"() : () -> ()
    %c0_5 = arith.constant 0 : index
    %6 = memref.load %arg7[%c0_5] : memref<1xf32, #tpu.memory_space<smem>>
    %7 = vector.broadcast %6 : f32 to vector<8x8xf32>
    %c0_6 = arith.constant 0 : index
    %c0_7 = arith.constant 0 : index
    %8 = memref.load %arg4[%c0_6, %c0_7] : memref<32x2xf32, #tpu.memory_space<smem>>
    %9 = vector.broadcast %8 : f32 to vector<8x8xf32>
    %10 = arith.mulf %0, %9 : vector<8x8xf32>
    %c0_8 = arith.constant 0 : index
    %c1 = arith.constant 1 : index
    %11 = memref.load %arg4[%c0_8, %c1] : memref<32x2xf32, #tpu.memory_space<smem>>
    %12 = vector.broadcast %11 : f32 to vector<8x8xf32>
    %13 = arith.mulf %5, %12 : vector<8x8xf32>
    %14 = arith.addf %10, %13 : vector<8x8xf32>
    %c0_9 = arith.constant 0 : index
    %15 = memref.load %arg5[%c0_9] : memref<32xf32, #tpu.memory_space<smem>>
    %16 = vector.broadcast %15 : f32 to vector<8x8xf32>
    %17 = arith.addf %14, %16 : vector<8x8xf32>
    %cst_10 = arith.constant 0.000000e+00 : f32
    %18 = vector.broadcast %cst_10 : f32 to vector<8x8xf32>
    %19 = arith.maximumf %17, %18 : vector<8x8xf32>
    %c0_11 = arith.constant 0 : index
    %20 = memref.load %arg6[%c0_11] : memref<32xf32, #tpu.memory_space<smem>>
    %21 = vector.broadcast %20 : f32 to vector<8x8xf32>
    %22 = arith.mulf %19, %21 : vector<8x8xf32>
    %23 = arith.addf %7, %22 : vector<8x8xf32>
    %c1_12 = arith.constant 1 : index
    %c0_13 = arith.constant 0 : index
    %24 = memref.load %arg4[%c1_12, %c0_13] : memref<32x2xf32, #tpu.memory_space<smem>>
    %25 = vector.broadcast %24 : f32 to vector<8x8xf32>
    %26 = arith.mulf %0, %25 : vector<8x8xf32>
    %c1_14 = arith.constant 1 : index
    %c1_15 = arith.constant 1 : index
    %27 = memref.load %arg4[%c1_14, %c1_15] : memref<32x2xf32, #tpu.memory_space<smem>>
    %28 = vector.broadcast %27 : f32 to vector<8x8xf32>
    %29 = arith.mulf %5, %28 : vector<8x8xf32>
    %30 = arith.addf %26, %29 : vector<8x8xf32>
    %c1_16 = arith.constant 1 : index
    %31 = memref.load %arg5[%c1_16] : memref<32xf32, #tpu.memory_space<smem>>
    %32 = vector.broadcast %31 : f32 to vector<8x8xf32>
    %33 = arith.addf %30, %32 : vector<8x8xf32>
    %cst_17 = arith.constant 0.000000e+00 : f32
    %34 = vector.broadcast %cst_17 : f32 to vector<8x8xf32>
    %35 = arith.maximumf %33, %34 : vector<8x8xf32>
    %c1_18 = arith.constant 1 : index
    %36 = memref.load %arg6[%c1_18] : memref<32xf32, #tpu.memory_space<smem>>
    %37 = vector.broadcast %36 : f32 to vector<8x8xf32>
    %38 = arith.mulf %35, %37 : vector<8x8xf32>
    %39 = arith.addf %23, %38 : vector<8x8xf32>
    %c2 = arith.constant 2 : index
    %c0_19 = arith.constant 0 : index
    %40 = memref.load %arg4[%c2, %c0_19] : memref<32x2xf32, #tpu.memory_space<smem>>
    %41 = vector.broadcast %40 : f32 to vector<8x8xf32>
    %42 = arith.mulf %0, %41 : vector<8x8xf32>
    %c2_20 = arith.constant 2 : index
    %c1_21 = arith.constant 1 : index
    %43 = memref.load %arg4[%c2_20, %c1_21] : memref<32x2xf32, #tpu.memory_space<smem>>
    %44 = vector.broadcast %43 : f32 to vector<8x8xf32>
    %45 = arith.mulf %5, %44 : vector<8x8xf32>
    %46 = arith.addf %42, %45 : vector<8x8xf32>
    %c2_22 = arith.constant 2 : index
    %47 = memref.load %arg5[%c2_22] : memref<32xf32, #tpu.memory_space<smem>>
    %48 = vector.broadcast %47 : f32 to vector<8x8xf32>
    %49 = arith.addf %46, %48 : vector<8x8xf32>
    %cst_23 = arith.constant 0.000000e+00 : f32
    %50 = vector.broadcast %cst_23 : f32 to vector<8x8xf32>
    %51 = arith.maximumf %49, %50 : vector<8x8xf32>
    %c2_24 = arith.constant 2 : index
    %52 = memref.load %arg6[%c2_24] : memref<32xf32, #tpu.memory_space<smem>>
    %53 = vector.broadcast %52 : f32 to vector<8x8xf32>
    %54 = arith.mulf %51, %53 : vector<8x8xf32>
    %55 = arith.addf %39, %54 : vector<8x8xf32>
    %c3 = arith.constant 3 : index
    %c0_25 = arith.constant 0 : index
    %56 = memref.load %arg4[%c3, %c0_25] : memref<32x2xf32, #tpu.memory_space<smem>>
    %57 = vector.broadcast %56 : f32 to vector<8x8xf32>
    %58 = arith.mulf %0, %57 : vector<8x8xf32>
    %c3_26 = arith.constant 3 : index
    %c1_27 = arith.constant 1 : index
    %59 = memref.load %arg4[%c3_26, %c1_27] : memref<32x2xf32, #tpu.memory_space<smem>>
    %60 = vector.broadcast %59 : f32 to vector<8x8xf32>
    %61 = arith.mulf %5, %60 : vector<8x8xf32>
    %62 = arith.addf %58, %61 : vector<8x8xf32>
    %c3_28 = arith.constant 3 : index
    %63 = memref.load %arg5[%c3_28] : memref<32xf32, #tpu.memory_space<smem>>
    %64 = vector.broadcast %63 : f32 to vector<8x8xf32>
    %65 = arith.addf %62, %64 : vector<8x8xf32>
    %cst_29 = arith.constant 0.000000e+00 : f32
    %66 = vector.broadcast %cst_29 : f32 to vector<8x8xf32>
    %67 = arith.maximumf %65, %66 : vector<8x8xf32>
    %c3_30 = arith.constant 3 : index
    %68 = memref.load %arg6[%c3_30] : memref<32xf32, #tpu.memory_space<smem>>
    %69 = vector.broadcast %68 : f32 to vector<8x8xf32>
    %70 = arith.mulf %67, %69 : vector<8x8xf32>
    %71 = arith.addf %55, %70 : vector<8x8xf32>
    %c4 = arith.constant 4 : index
    %c0_31 = arith.constant 0 : index
    %72 = memref.load %arg4[%c4, %c0_31] : memref<32x2xf32, #tpu.memory_space<smem>>
    %73 = vector.broadcast %72 : f32 to vector<8x8xf32>
    %74 = arith.mulf %0, %73 : vector<8x8xf32>
    %c4_32 = arith.constant 4 : index
    %c1_33 = arith.constant 1 : index
    %75 = memref.load %arg4[%c4_32, %c1_33] : memref<32x2xf32, #tpu.memory_space<smem>>
    %76 = vector.broadcast %75 : f32 to vector<8x8xf32>
    %77 = arith.mulf %5, %76 : vector<8x8xf32>
    %78 = arith.addf %74, %77 : vector<8x8xf32>
    %c4_34 = arith.constant 4 : index
    %79 = memref.load %arg5[%c4_34] : memref<32xf32, #tpu.memory_space<smem>>
    %80 = vector.broadcast %79 : f32 to vector<8x8xf32>
    %81 = arith.addf %78, %80 : vector<8x8xf32>
    %cst_35 = arith.constant 0.000000e+00 : f32
    %82 = vector.broadcast %cst_35 : f32 to vector<8x8xf32>
    %83 = arith.maximumf %81, %82 : vector<8x8xf32>
    %c4_36 = arith.constant 4 : index
    %84 = memref.load %arg6[%c4_36] : memref<32xf32, #tpu.memory_space<smem>>
    %85 = vector.broadcast %84 : f32 to vector<8x8xf32>
    %86 = arith.mulf %83, %85 : vector<8x8xf32>
    %87 = arith.addf %71, %86 : vector<8x8xf32>
    %c5 = arith.constant 5 : index
    %c0_37 = arith.constant 0 : index
    %88 = memref.load %arg4[%c5, %c0_37] : memref<32x2xf32, #tpu.memory_space<smem>>
    %89 = vector.broadcast %88 : f32 to vector<8x8xf32>
    %90 = arith.mulf %0, %89 : vector<8x8xf32>
    %c5_38 = arith.constant 5 : index
    %c1_39 = arith.constant 1 : index
    %91 = memref.load %arg4[%c5_38, %c1_39] : memref<32x2xf32, #tpu.memory_space<smem>>
    %92 = vector.broadcast %91 : f32 to vector<8x8xf32>
    %93 = arith.mulf %5, %92 : vector<8x8xf32>
    %94 = arith.addf %90, %93 : vector<8x8xf32>
    %c5_40 = arith.constant 5 : index
    %95 = memref.load %arg5[%c5_40] : memref<32xf32, #tpu.memory_space<smem>>
    %96 = vector.broadcast %95 : f32 to vector<8x8xf32>
    %97 = arith.addf %94, %96 : vector<8x8xf32>
    %cst_41 = arith.constant 0.000000e+00 : f32
    %98 = vector.broadcast %cst_41 : f32 to vector<8x8xf32>
    %99 = arith.maximumf %97, %98 : vector<8x8xf32>
    %c5_42 = arith.constant 5 : index
    %100 = memref.load %arg6[%c5_42] : memref<32xf32, #tpu.memory_space<smem>>
    %101 = vector.broadcast %100 : f32 to vector<8x8xf32>
    %102 = arith.mulf %99, %101 : vector<8x8xf32>
    %103 = arith.addf %87, %102 : vector<8x8xf32>
    %c6 = arith.constant 6 : index
    %c0_43 = arith.constant 0 : index
    %104 = memref.load %arg4[%c6, %c0_43] : memref<32x2xf32, #tpu.memory_space<smem>>
    %105 = vector.broadcast %104 : f32 to vector<8x8xf32>
    %106 = arith.mulf %0, %105 : vector<8x8xf32>
    %c6_44 = arith.constant 6 : index
    %c1_45 = arith.constant 1 : index
    %107 = memref.load %arg4[%c6_44, %c1_45] : memref<32x2xf32, #tpu.memory_space<smem>>
    %108 = vector.broadcast %107 : f32 to vector<8x8xf32>
    %109 = arith.mulf %5, %108 : vector<8x8xf32>
    %110 = arith.addf %106, %109 : vector<8x8xf32>
    %c6_46 = arith.constant 6 : index
    %111 = memref.load %arg5[%c6_46] : memref<32xf32, #tpu.memory_space<smem>>
    %112 = vector.broadcast %111 : f32 to vector<8x8xf32>
    %113 = arith.addf %110, %112 : vector<8x8xf32>
    %cst_47 = arith.constant 0.000000e+00 : f32
    %114 = vector.broadcast %cst_47 : f32 to vector<8x8xf32>
    %115 = arith.maximumf %113, %114 : vector<8x8xf32>
    %c6_48 = arith.constant 6 : index
    %116 = memref.load %arg6[%c6_48] : memref<32xf32, #tpu.memory_space<smem>>
    %117 = vector.broadcast %116 : f32 to vector<8x8xf32>
    %118 = arith.mulf %115, %117 : vector<8x8xf32>
    %119 = arith.addf %103, %118 : vector<8x8xf32>
    %c7 = arith.constant 7 : index
    %c0_49 = arith.constant 0 : index
    %120 = memref.load %arg4[%c7, %c0_49] : memref<32x2xf32, #tpu.memory_space<smem>>
    %121 = vector.broadcast %120 : f32 to vector<8x8xf32>
    %122 = arith.mulf %0, %121 : vector<8x8xf32>
    %c7_50 = arith.constant 7 : index
    %c1_51 = arith.constant 1 : index
    %123 = memref.load %arg4[%c7_50, %c1_51] : memref<32x2xf32, #tpu.memory_space<smem>>
    %124 = vector.broadcast %123 : f32 to vector<8x8xf32>
    %125 = arith.mulf %5, %124 : vector<8x8xf32>
    %126 = arith.addf %122, %125 : vector<8x8xf32>
    %c7_52 = arith.constant 7 : index
    %127 = memref.load %arg5[%c7_52] : memref<32xf32, #tpu.memory_space<smem>>
    %128 = vector.broadcast %127 : f32 to vector<8x8xf32>
    %129 = arith.addf %126, %128 : vector<8x8xf32>
    %cst_53 = arith.constant 0.000000e+00 : f32
    %130 = vector.broadcast %cst_53 : f32 to vector<8x8xf32>
    %131 = arith.maximumf %129, %130 : vector<8x8xf32>
    %c7_54 = arith.constant 7 : index
    %132 = memref.load %arg6[%c7_54] : memref<32xf32, #tpu.memory_space<smem>>
    %133 = vector.broadcast %132 : f32 to vector<8x8xf32>
    %134 = arith.mulf %131, %133 : vector<8x8xf32>
    %135 = arith.addf %119, %134 : vector<8x8xf32>
    %c8 = arith.constant 8 : index
    %c0_55 = arith.constant 0 : index
    %136 = memref.load %arg4[%c8, %c0_55] : memref<32x2xf32, #tpu.memory_space<smem>>
    %137 = vector.broadcast %136 : f32 to vector<8x8xf32>
    %138 = arith.mulf %0, %137 : vector<8x8xf32>
    %c8_56 = arith.constant 8 : index
    %c1_57 = arith.constant 1 : index
    %139 = memref.load %arg4[%c8_56, %c1_57] : memref<32x2xf32, #tpu.memory_space<smem>>
    %140 = vector.broadcast %139 : f32 to vector<8x8xf32>
    %141 = arith.mulf %5, %140 : vector<8x8xf32>
    %142 = arith.addf %138, %141 : vector<8x8xf32>
    %c8_58 = arith.constant 8 : index
    %143 = memref.load %arg5[%c8_58] : memref<32xf32, #tpu.memory_space<smem>>
    %144 = vector.broadcast %143 : f32 to vector<8x8xf32>
    %145 = arith.addf %142, %144 : vector<8x8xf32>
    %cst_59 = arith.constant 0.000000e+00 : f32
    %146 = vector.broadcast %cst_59 : f32 to vector<8x8xf32>
    %147 = arith.maximumf %145, %146 : vector<8x8xf32>
    %c8_60 = arith.constant 8 : index
    %148 = memref.load %arg6[%c8_60] : memref<32xf32, #tpu.memory_space<smem>>
    %149 = vector.broadcast %148 : f32 to vector<8x8xf32>
    %150 = arith.mulf %147, %149 : vector<8x8xf32>
    %151 = arith.addf %135, %150 : vector<8x8xf32>
    %c9 = arith.constant 9 : index
    %c0_61 = arith.constant 0 : index
    %152 = memref.load %arg4[%c9, %c0_61] : memref<32x2xf32, #tpu.memory_space<smem>>
    %153 = vector.broadcast %152 : f32 to vector<8x8xf32>
    %154 = arith.mulf %0, %153 : vector<8x8xf32>
    %c9_62 = arith.constant 9 : index
    %c1_63 = arith.constant 1 : index
    %155 = memref.load %arg4[%c9_62, %c1_63] : memref<32x2xf32, #tpu.memory_space<smem>>
    %156 = vector.broadcast %155 : f32 to vector<8x8xf32>
    %157 = arith.mulf %5, %156 : vector<8x8xf32>
    %158 = arith.addf %154, %157 : vector<8x8xf32>
    %c9_64 = arith.constant 9 : index
    %159 = memref.load %arg5[%c9_64] : memref<32xf32, #tpu.memory_space<smem>>
    %160 = vector.broadcast %159 : f32 to vector<8x8xf32>
    %161 = arith.addf %158, %160 : vector<8x8xf32>
    %cst_65 = arith.constant 0.000000e+00 : f32
    %162 = vector.broadcast %cst_65 : f32 to vector<8x8xf32>
    %163 = arith.maximumf %161, %162 : vector<8x8xf32>
    %c9_66 = arith.constant 9 : index
    %164 = memref.load %arg6[%c9_66] : memref<32xf32, #tpu.memory_space<smem>>
    %165 = vector.broadcast %164 : f32 to vector<8x8xf32>
    %166 = arith.mulf %163, %165 : vector<8x8xf32>
    %167 = arith.addf %151, %166 : vector<8x8xf32>
    %c10 = arith.constant 10 : index
    %c0_67 = arith.constant 0 : index
    %168 = memref.load %arg4[%c10, %c0_67] : memref<32x2xf32, #tpu.memory_space<smem>>
    %169 = vector.broadcast %168 : f32 to vector<8x8xf32>
    %170 = arith.mulf %0, %169 : vector<8x8xf32>
    %c10_68 = arith.constant 10 : index
    %c1_69 = arith.constant 1 : index
    %171 = memref.load %arg4[%c10_68, %c1_69] : memref<32x2xf32, #tpu.memory_space<smem>>
    %172 = vector.broadcast %171 : f32 to vector<8x8xf32>
    %173 = arith.mulf %5, %172 : vector<8x8xf32>
    %174 = arith.addf %170, %173 : vector<8x8xf32>
    %c10_70 = arith.constant 10 : index
    %175 = memref.load %arg5[%c10_70] : memref<32xf32, #tpu.memory_space<smem>>
    %176 = vector.broadcast %175 : f32 to vector<8x8xf32>
    %177 = arith.addf %174, %176 : vector<8x8xf32>
    %cst_71 = arith.constant 0.000000e+00 : f32
    %178 = vector.broadcast %cst_71 : f32 to vector<8x8xf32>
    %179 = arith.maximumf %177, %178 : vector<8x8xf32>
    %c10_72 = arith.constant 10 : index
    %180 = memref.load %arg6[%c10_72] : memref<32xf32, #tpu.memory_space<smem>>
    %181 = vector.broadcast %180 : f32 to vector<8x8xf32>
    %182 = arith.mulf %179, %181 : vector<8x8xf32>
    %183 = arith.addf %167, %182 : vector<8x8xf32>
    %c11 = arith.constant 11 : index
    %c0_73 = arith.constant 0 : index
    %184 = memref.load %arg4[%c11, %c0_73] : memref<32x2xf32, #tpu.memory_space<smem>>
    %185 = vector.broadcast %184 : f32 to vector<8x8xf32>
    %186 = arith.mulf %0, %185 : vector<8x8xf32>
    %c11_74 = arith.constant 11 : index
    %c1_75 = arith.constant 1 : index
    %187 = memref.load %arg4[%c11_74, %c1_75] : memref<32x2xf32, #tpu.memory_space<smem>>
    %188 = vector.broadcast %187 : f32 to vector<8x8xf32>
    %189 = arith.mulf %5, %188 : vector<8x8xf32>
    %190 = arith.addf %186, %189 : vector<8x8xf32>
    %c11_76 = arith.constant 11 : index
    %191 = memref.load %arg5[%c11_76] : memref<32xf32, #tpu.memory_space<smem>>
    %192 = vector.broadcast %191 : f32 to vector<8x8xf32>
    %193 = arith.addf %190, %192 : vector<8x8xf32>
    %cst_77 = arith.constant 0.000000e+00 : f32
    %194 = vector.broadcast %cst_77 : f32 to vector<8x8xf32>
    %195 = arith.maximumf %193, %194 : vector<8x8xf32>
    %c11_78 = arith.constant 11 : index
    %196 = memref.load %arg6[%c11_78] : memref<32xf32, #tpu.memory_space<smem>>
    %197 = vector.broadcast %196 : f32 to vector<8x8xf32>
    %198 = arith.mulf %195, %197 : vector<8x8xf32>
    %199 = arith.addf %183, %198 : vector<8x8xf32>
    %c12 = arith.constant 12 : index
    %c0_79 = arith.constant 0 : index
    %200 = memref.load %arg4[%c12, %c0_79] : memref<32x2xf32, #tpu.memory_space<smem>>
    %201 = vector.broadcast %200 : f32 to vector<8x8xf32>
    %202 = arith.mulf %0, %201 : vector<8x8xf32>
    %c12_80 = arith.constant 12 : index
    %c1_81 = arith.constant 1 : index
    %203 = memref.load %arg4[%c12_80, %c1_81] : memref<32x2xf32, #tpu.memory_space<smem>>
    %204 = vector.broadcast %203 : f32 to vector<8x8xf32>
    %205 = arith.mulf %5, %204 : vector<8x8xf32>
    %206 = arith.addf %202, %205 : vector<8x8xf32>
    %c12_82 = arith.constant 12 : index
    %207 = memref.load %arg5[%c12_82] : memref<32xf32, #tpu.memory_space<smem>>
    %208 = vector.broadcast %207 : f32 to vector<8x8xf32>
    %209 = arith.addf %206, %208 : vector<8x8xf32>
    %cst_83 = arith.constant 0.000000e+00 : f32
    %210 = vector.broadcast %cst_83 : f32 to vector<8x8xf32>
    %211 = arith.maximumf %209, %210 : vector<8x8xf32>
    %c12_84 = arith.constant 12 : index
    %212 = memref.load %arg6[%c12_84] : memref<32xf32, #tpu.memory_space<smem>>
    %213 = vector.broadcast %212 : f32 to vector<8x8xf32>
    %214 = arith.mulf %211, %213 : vector<8x8xf32>
    %215 = arith.addf %199, %214 : vector<8x8xf32>
    %c13 = arith.constant 13 : index
    %c0_85 = arith.constant 0 : index
    %216 = memref.load %arg4[%c13, %c0_85] : memref<32x2xf32, #tpu.memory_space<smem>>
    %217 = vector.broadcast %216 : f32 to vector<8x8xf32>
    %218 = arith.mulf %0, %217 : vector<8x8xf32>
    %c13_86 = arith.constant 13 : index
    %c1_87 = arith.constant 1 : index
    %219 = memref.load %arg4[%c13_86, %c1_87] : memref<32x2xf32, #tpu.memory_space<smem>>
    %220 = vector.broadcast %219 : f32 to vector<8x8xf32>
    %221 = arith.mulf %5, %220 : vector<8x8xf32>
    %222 = arith.addf %218, %221 : vector<8x8xf32>
    %c13_88 = arith.constant 13 : index
    %223 = memref.load %arg5[%c13_88] : memref<32xf32, #tpu.memory_space<smem>>
    %224 = vector.broadcast %223 : f32 to vector<8x8xf32>
    %225 = arith.addf %222, %224 : vector<8x8xf32>
    %cst_89 = arith.constant 0.000000e+00 : f32
    %226 = vector.broadcast %cst_89 : f32 to vector<8x8xf32>
    %227 = arith.maximumf %225, %226 : vector<8x8xf32>
    %c13_90 = arith.constant 13 : index
    %228 = memref.load %arg6[%c13_90] : memref<32xf32, #tpu.memory_space<smem>>
    %229 = vector.broadcast %228 : f32 to vector<8x8xf32>
    %230 = arith.mulf %227, %229 : vector<8x8xf32>
    %231 = arith.addf %215, %230 : vector<8x8xf32>
    %c14 = arith.constant 14 : index
    %c0_91 = arith.constant 0 : index
    %232 = memref.load %arg4[%c14, %c0_91] : memref<32x2xf32, #tpu.memory_space<smem>>
    %233 = vector.broadcast %232 : f32 to vector<8x8xf32>
    %234 = arith.mulf %0, %233 : vector<8x8xf32>
    %c14_92 = arith.constant 14 : index
    %c1_93 = arith.constant 1 : index
    %235 = memref.load %arg4[%c14_92, %c1_93] : memref<32x2xf32, #tpu.memory_space<smem>>
    %236 = vector.broadcast %235 : f32 to vector<8x8xf32>
    %237 = arith.mulf %5, %236 : vector<8x8xf32>
    %238 = arith.addf %234, %237 : vector<8x8xf32>
    %c14_94 = arith.constant 14 : index
    %239 = memref.load %arg5[%c14_94] : memref<32xf32, #tpu.memory_space<smem>>
    %240 = vector.broadcast %239 : f32 to vector<8x8xf32>
    %241 = arith.addf %238, %240 : vector<8x8xf32>
    %cst_95 = arith.constant 0.000000e+00 : f32
    %242 = vector.broadcast %cst_95 : f32 to vector<8x8xf32>
    %243 = arith.maximumf %241, %242 : vector<8x8xf32>
    %c14_96 = arith.constant 14 : index
    %244 = memref.load %arg6[%c14_96] : memref<32xf32, #tpu.memory_space<smem>>
    %245 = vector.broadcast %244 : f32 to vector<8x8xf32>
    %246 = arith.mulf %243, %245 : vector<8x8xf32>
    %247 = arith.addf %231, %246 : vector<8x8xf32>
    %c15 = arith.constant 15 : index
    %c0_97 = arith.constant 0 : index
    %248 = memref.load %arg4[%c15, %c0_97] : memref<32x2xf32, #tpu.memory_space<smem>>
    %249 = vector.broadcast %248 : f32 to vector<8x8xf32>
    %250 = arith.mulf %0, %249 : vector<8x8xf32>
    %c15_98 = arith.constant 15 : index
    %c1_99 = arith.constant 1 : index
    %251 = memref.load %arg4[%c15_98, %c1_99] : memref<32x2xf32, #tpu.memory_space<smem>>
    %252 = vector.broadcast %251 : f32 to vector<8x8xf32>
    %253 = arith.mulf %5, %252 : vector<8x8xf32>
    %254 = arith.addf %250, %253 : vector<8x8xf32>
    %c15_100 = arith.constant 15 : index
    %255 = memref.load %arg5[%c15_100] : memref<32xf32, #tpu.memory_space<smem>>
    %256 = vector.broadcast %255 : f32 to vector<8x8xf32>
    %257 = arith.addf %254, %256 : vector<8x8xf32>
    %cst_101 = arith.constant 0.000000e+00 : f32
    %258 = vector.broadcast %cst_101 : f32 to vector<8x8xf32>
    %259 = arith.maximumf %257, %258 : vector<8x8xf32>
    %c15_102 = arith.constant 15 : index
    %260 = memref.load %arg6[%c15_102] : memref<32xf32, #tpu.memory_space<smem>>
    %261 = vector.broadcast %260 : f32 to vector<8x8xf32>
    %262 = arith.mulf %259, %261 : vector<8x8xf32>
    %263 = arith.addf %247, %262 : vector<8x8xf32>
    %c16 = arith.constant 16 : index
    %c0_103 = arith.constant 0 : index
    %264 = memref.load %arg4[%c16, %c0_103] : memref<32x2xf32, #tpu.memory_space<smem>>
    %265 = vector.broadcast %264 : f32 to vector<8x8xf32>
    %266 = arith.mulf %0, %265 : vector<8x8xf32>
    %c16_104 = arith.constant 16 : index
    %c1_105 = arith.constant 1 : index
    %267 = memref.load %arg4[%c16_104, %c1_105] : memref<32x2xf32, #tpu.memory_space<smem>>
    %268 = vector.broadcast %267 : f32 to vector<8x8xf32>
    %269 = arith.mulf %5, %268 : vector<8x8xf32>
    %270 = arith.addf %266, %269 : vector<8x8xf32>
    %c16_106 = arith.constant 16 : index
    %271 = memref.load %arg5[%c16_106] : memref<32xf32, #tpu.memory_space<smem>>
    %272 = vector.broadcast %271 : f32 to vector<8x8xf32>
    %273 = arith.addf %270, %272 : vector<8x8xf32>
    %cst_107 = arith.constant 0.000000e+00 : f32
    %274 = vector.broadcast %cst_107 : f32 to vector<8x8xf32>
    %275 = arith.maximumf %273, %274 : vector<8x8xf32>
    %c16_108 = arith.constant 16 : index
    %276 = memref.load %arg6[%c16_108] : memref<32xf32, #tpu.memory_space<smem>>
    %277 = vector.broadcast %276 : f32 to vector<8x8xf32>
    %278 = arith.mulf %275, %277 : vector<8x8xf32>
    %279 = arith.addf %263, %278 : vector<8x8xf32>
    %c17 = arith.constant 17 : index
    %c0_109 = arith.constant 0 : index
    %280 = memref.load %arg4[%c17, %c0_109] : memref<32x2xf32, #tpu.memory_space<smem>>
    %281 = vector.broadcast %280 : f32 to vector<8x8xf32>
    %282 = arith.mulf %0, %281 : vector<8x8xf32>
    %c17_110 = arith.constant 17 : index
    %c1_111 = arith.constant 1 : index
    %283 = memref.load %arg4[%c17_110, %c1_111] : memref<32x2xf32, #tpu.memory_space<smem>>
    %284 = vector.broadcast %283 : f32 to vector<8x8xf32>
    %285 = arith.mulf %5, %284 : vector<8x8xf32>
    %286 = arith.addf %282, %285 : vector<8x8xf32>
    %c17_112 = arith.constant 17 : index
    %287 = memref.load %arg5[%c17_112] : memref<32xf32, #tpu.memory_space<smem>>
    %288 = vector.broadcast %287 : f32 to vector<8x8xf32>
    %289 = arith.addf %286, %288 : vector<8x8xf32>
    %cst_113 = arith.constant 0.000000e+00 : f32
    %290 = vector.broadcast %cst_113 : f32 to vector<8x8xf32>
    %291 = arith.maximumf %289, %290 : vector<8x8xf32>
    %c17_114 = arith.constant 17 : index
    %292 = memref.load %arg6[%c17_114] : memref<32xf32, #tpu.memory_space<smem>>
    %293 = vector.broadcast %292 : f32 to vector<8x8xf32>
    %294 = arith.mulf %291, %293 : vector<8x8xf32>
    %295 = arith.addf %279, %294 : vector<8x8xf32>
    %c18 = arith.constant 18 : index
    %c0_115 = arith.constant 0 : index
    %296 = memref.load %arg4[%c18, %c0_115] : memref<32x2xf32, #tpu.memory_space<smem>>
    %297 = vector.broadcast %296 : f32 to vector<8x8xf32>
    %298 = arith.mulf %0, %297 : vector<8x8xf32>
    %c18_116 = arith.constant 18 : index
    %c1_117 = arith.constant 1 : index
    %299 = memref.load %arg4[%c18_116, %c1_117] : memref<32x2xf32, #tpu.memory_space<smem>>
    %300 = vector.broadcast %299 : f32 to vector<8x8xf32>
    %301 = arith.mulf %5, %300 : vector<8x8xf32>
    %302 = arith.addf %298, %301 : vector<8x8xf32>
    %c18_118 = arith.constant 18 : index
    %303 = memref.load %arg5[%c18_118] : memref<32xf32, #tpu.memory_space<smem>>
    %304 = vector.broadcast %303 : f32 to vector<8x8xf32>
    %305 = arith.addf %302, %304 : vector<8x8xf32>
    %cst_119 = arith.constant 0.000000e+00 : f32
    %306 = vector.broadcast %cst_119 : f32 to vector<8x8xf32>
    %307 = arith.maximumf %305, %306 : vector<8x8xf32>
    %c18_120 = arith.constant 18 : index
    %308 = memref.load %arg6[%c18_120] : memref<32xf32, #tpu.memory_space<smem>>
    %309 = vector.broadcast %308 : f32 to vector<8x8xf32>
    %310 = arith.mulf %307, %309 : vector<8x8xf32>
    %311 = arith.addf %295, %310 : vector<8x8xf32>
    %c19 = arith.constant 19 : index
    %c0_121 = arith.constant 0 : index
    %312 = memref.load %arg4[%c19, %c0_121] : memref<32x2xf32, #tpu.memory_space<smem>>
    %313 = vector.broadcast %312 : f32 to vector<8x8xf32>
    %314 = arith.mulf %0, %313 : vector<8x8xf32>
    %c19_122 = arith.constant 19 : index
    %c1_123 = arith.constant 1 : index
    %315 = memref.load %arg4[%c19_122, %c1_123] : memref<32x2xf32, #tpu.memory_space<smem>>
    %316 = vector.broadcast %315 : f32 to vector<8x8xf32>
    %317 = arith.mulf %5, %316 : vector<8x8xf32>
    %318 = arith.addf %314, %317 : vector<8x8xf32>
    %c19_124 = arith.constant 19 : index
    %319 = memref.load %arg5[%c19_124] : memref<32xf32, #tpu.memory_space<smem>>
    %320 = vector.broadcast %319 : f32 to vector<8x8xf32>
    %321 = arith.addf %318, %320 : vector<8x8xf32>
    %cst_125 = arith.constant 0.000000e+00 : f32
    %322 = vector.broadcast %cst_125 : f32 to vector<8x8xf32>
    %323 = arith.maximumf %321, %322 : vector<8x8xf32>
    %c19_126 = arith.constant 19 : index
    %324 = memref.load %arg6[%c19_126] : memref<32xf32, #tpu.memory_space<smem>>
    %325 = vector.broadcast %324 : f32 to vector<8x8xf32>
    %326 = arith.mulf %323, %325 : vector<8x8xf32>
    %327 = arith.addf %311, %326 : vector<8x8xf32>
    %c20 = arith.constant 20 : index
    %c0_127 = arith.constant 0 : index
    %328 = memref.load %arg4[%c20, %c0_127] : memref<32x2xf32, #tpu.memory_space<smem>>
    %329 = vector.broadcast %328 : f32 to vector<8x8xf32>
    %330 = arith.mulf %0, %329 : vector<8x8xf32>
    %c20_128 = arith.constant 20 : index
    %c1_129 = arith.constant 1 : index
    %331 = memref.load %arg4[%c20_128, %c1_129] : memref<32x2xf32, #tpu.memory_space<smem>>
    %332 = vector.broadcast %331 : f32 to vector<8x8xf32>
    %333 = arith.mulf %5, %332 : vector<8x8xf32>
    %334 = arith.addf %330, %333 : vector<8x8xf32>
    %c20_130 = arith.constant 20 : index
    %335 = memref.load %arg5[%c20_130] : memref<32xf32, #tpu.memory_space<smem>>
    %336 = vector.broadcast %335 : f32 to vector<8x8xf32>
    %337 = arith.addf %334, %336 : vector<8x8xf32>
    %cst_131 = arith.constant 0.000000e+00 : f32
    %338 = vector.broadcast %cst_131 : f32 to vector<8x8xf32>
    %339 = arith.maximumf %337, %338 : vector<8x8xf32>
    %c20_132 = arith.constant 20 : index
    %340 = memref.load %arg6[%c20_132] : memref<32xf32, #tpu.memory_space<smem>>
    %341 = vector.broadcast %340 : f32 to vector<8x8xf32>
    %342 = arith.mulf %339, %341 : vector<8x8xf32>
    %343 = arith.addf %327, %342 : vector<8x8xf32>
    %c21 = arith.constant 21 : index
    %c0_133 = arith.constant 0 : index
    %344 = memref.load %arg4[%c21, %c0_133] : memref<32x2xf32, #tpu.memory_space<smem>>
    %345 = vector.broadcast %344 : f32 to vector<8x8xf32>
    %346 = arith.mulf %0, %345 : vector<8x8xf32>
    %c21_134 = arith.constant 21 : index
    %c1_135 = arith.constant 1 : index
    %347 = memref.load %arg4[%c21_134, %c1_135] : memref<32x2xf32, #tpu.memory_space<smem>>
    %348 = vector.broadcast %347 : f32 to vector<8x8xf32>
    %349 = arith.mulf %5, %348 : vector<8x8xf32>
    %350 = arith.addf %346, %349 : vector<8x8xf32>
    %c21_136 = arith.constant 21 : index
    %351 = memref.load %arg5[%c21_136] : memref<32xf32, #tpu.memory_space<smem>>
    %352 = vector.broadcast %351 : f32 to vector<8x8xf32>
    %353 = arith.addf %350, %352 : vector<8x8xf32>
    %cst_137 = arith.constant 0.000000e+00 : f32
    %354 = vector.broadcast %cst_137 : f32 to vector<8x8xf32>
    %355 = arith.maximumf %353, %354 : vector<8x8xf32>
    %c21_138 = arith.constant 21 : index
    %356 = memref.load %arg6[%c21_138] : memref<32xf32, #tpu.memory_space<smem>>
    %357 = vector.broadcast %356 : f32 to vector<8x8xf32>
    %358 = arith.mulf %355, %357 : vector<8x8xf32>
    %359 = arith.addf %343, %358 : vector<8x8xf32>
    %c22 = arith.constant 22 : index
    %c0_139 = arith.constant 0 : index
    %360 = memref.load %arg4[%c22, %c0_139] : memref<32x2xf32, #tpu.memory_space<smem>>
    %361 = vector.broadcast %360 : f32 to vector<8x8xf32>
    %362 = arith.mulf %0, %361 : vector<8x8xf32>
    %c22_140 = arith.constant 22 : index
    %c1_141 = arith.constant 1 : index
    %363 = memref.load %arg4[%c22_140, %c1_141] : memref<32x2xf32, #tpu.memory_space<smem>>
    %364 = vector.broadcast %363 : f32 to vector<8x8xf32>
    %365 = arith.mulf %5, %364 : vector<8x8xf32>
    %366 = arith.addf %362, %365 : vector<8x8xf32>
    %c22_142 = arith.constant 22 : index
    %367 = memref.load %arg5[%c22_142] : memref<32xf32, #tpu.memory_space<smem>>
    %368 = vector.broadcast %367 : f32 to vector<8x8xf32>
    %369 = arith.addf %366, %368 : vector<8x8xf32>
    %cst_143 = arith.constant 0.000000e+00 : f32
    %370 = vector.broadcast %cst_143 : f32 to vector<8x8xf32>
    %371 = arith.maximumf %369, %370 : vector<8x8xf32>
    %c22_144 = arith.constant 22 : index
    %372 = memref.load %arg6[%c22_144] : memref<32xf32, #tpu.memory_space<smem>>
    %373 = vector.broadcast %372 : f32 to vector<8x8xf32>
    %374 = arith.mulf %371, %373 : vector<8x8xf32>
    %375 = arith.addf %359, %374 : vector<8x8xf32>
    %c23 = arith.constant 23 : index
    %c0_145 = arith.constant 0 : index
    %376 = memref.load %arg4[%c23, %c0_145] : memref<32x2xf32, #tpu.memory_space<smem>>
    %377 = vector.broadcast %376 : f32 to vector<8x8xf32>
    %378 = arith.mulf %0, %377 : vector<8x8xf32>
    %c23_146 = arith.constant 23 : index
    %c1_147 = arith.constant 1 : index
    %379 = memref.load %arg4[%c23_146, %c1_147] : memref<32x2xf32, #tpu.memory_space<smem>>
    %380 = vector.broadcast %379 : f32 to vector<8x8xf32>
    %381 = arith.mulf %5, %380 : vector<8x8xf32>
    %382 = arith.addf %378, %381 : vector<8x8xf32>
    %c23_148 = arith.constant 23 : index
    %383 = memref.load %arg5[%c23_148] : memref<32xf32, #tpu.memory_space<smem>>
    %384 = vector.broadcast %383 : f32 to vector<8x8xf32>
    %385 = arith.addf %382, %384 : vector<8x8xf32>
    %cst_149 = arith.constant 0.000000e+00 : f32
    %386 = vector.broadcast %cst_149 : f32 to vector<8x8xf32>
    %387 = arith.maximumf %385, %386 : vector<8x8xf32>
    %c23_150 = arith.constant 23 : index
    %388 = memref.load %arg6[%c23_150] : memref<32xf32, #tpu.memory_space<smem>>
    %389 = vector.broadcast %388 : f32 to vector<8x8xf32>
    %390 = arith.mulf %387, %389 : vector<8x8xf32>
    %391 = arith.addf %375, %390 : vector<8x8xf32>
    %c24 = arith.constant 24 : index
    %c0_151 = arith.constant 0 : index
    %392 = memref.load %arg4[%c24, %c0_151] : memref<32x2xf32, #tpu.memory_space<smem>>
    %393 = vector.broadcast %392 : f32 to vector<8x8xf32>
    %394 = arith.mulf %0, %393 : vector<8x8xf32>
    %c24_152 = arith.constant 24 : index
    %c1_153 = arith.constant 1 : index
    %395 = memref.load %arg4[%c24_152, %c1_153] : memref<32x2xf32, #tpu.memory_space<smem>>
    %396 = vector.broadcast %395 : f32 to vector<8x8xf32>
    %397 = arith.mulf %5, %396 : vector<8x8xf32>
    %398 = arith.addf %394, %397 : vector<8x8xf32>
    %c24_154 = arith.constant 24 : index
    %399 = memref.load %arg5[%c24_154] : memref<32xf32, #tpu.memory_space<smem>>
    %400 = vector.broadcast %399 : f32 to vector<8x8xf32>
    %401 = arith.addf %398, %400 : vector<8x8xf32>
    %cst_155 = arith.constant 0.000000e+00 : f32
    %402 = vector.broadcast %cst_155 : f32 to vector<8x8xf32>
    %403 = arith.maximumf %401, %402 : vector<8x8xf32>
    %c24_156 = arith.constant 24 : index
    %404 = memref.load %arg6[%c24_156] : memref<32xf32, #tpu.memory_space<smem>>
    %405 = vector.broadcast %404 : f32 to vector<8x8xf32>
    %406 = arith.mulf %403, %405 : vector<8x8xf32>
    %407 = arith.addf %391, %406 : vector<8x8xf32>
    %c25 = arith.constant 25 : index
    %c0_157 = arith.constant 0 : index
    %408 = memref.load %arg4[%c25, %c0_157] : memref<32x2xf32, #tpu.memory_space<smem>>
    %409 = vector.broadcast %408 : f32 to vector<8x8xf32>
    %410 = arith.mulf %0, %409 : vector<8x8xf32>
    %c25_158 = arith.constant 25 : index
    %c1_159 = arith.constant 1 : index
    %411 = memref.load %arg4[%c25_158, %c1_159] : memref<32x2xf32, #tpu.memory_space<smem>>
    %412 = vector.broadcast %411 : f32 to vector<8x8xf32>
    %413 = arith.mulf %5, %412 : vector<8x8xf32>
    %414 = arith.addf %410, %413 : vector<8x8xf32>
    %c25_160 = arith.constant 25 : index
    %415 = memref.load %arg5[%c25_160] : memref<32xf32, #tpu.memory_space<smem>>
    %416 = vector.broadcast %415 : f32 to vector<8x8xf32>
    %417 = arith.addf %414, %416 : vector<8x8xf32>
    %cst_161 = arith.constant 0.000000e+00 : f32
    %418 = vector.broadcast %cst_161 : f32 to vector<8x8xf32>
    %419 = arith.maximumf %417, %418 : vector<8x8xf32>
    %c25_162 = arith.constant 25 : index
    %420 = memref.load %arg6[%c25_162] : memref<32xf32, #tpu.memory_space<smem>>
    %421 = vector.broadcast %420 : f32 to vector<8x8xf32>
    %422 = arith.mulf %419, %421 : vector<8x8xf32>
    %423 = arith.addf %407, %422 : vector<8x8xf32>
    %c26 = arith.constant 26 : index
    %c0_163 = arith.constant 0 : index
    %424 = memref.load %arg4[%c26, %c0_163] : memref<32x2xf32, #tpu.memory_space<smem>>
    %425 = vector.broadcast %424 : f32 to vector<8x8xf32>
    %426 = arith.mulf %0, %425 : vector<8x8xf32>
    %c26_164 = arith.constant 26 : index
    %c1_165 = arith.constant 1 : index
    %427 = memref.load %arg4[%c26_164, %c1_165] : memref<32x2xf32, #tpu.memory_space<smem>>
    %428 = vector.broadcast %427 : f32 to vector<8x8xf32>
    %429 = arith.mulf %5, %428 : vector<8x8xf32>
    %430 = arith.addf %426, %429 : vector<8x8xf32>
    %c26_166 = arith.constant 26 : index
    %431 = memref.load %arg5[%c26_166] : memref<32xf32, #tpu.memory_space<smem>>
    %432 = vector.broadcast %431 : f32 to vector<8x8xf32>
    %433 = arith.addf %430, %432 : vector<8x8xf32>
    %cst_167 = arith.constant 0.000000e+00 : f32
    %434 = vector.broadcast %cst_167 : f32 to vector<8x8xf32>
    %435 = arith.maximumf %433, %434 : vector<8x8xf32>
    %c26_168 = arith.constant 26 : index
    %436 = memref.load %arg6[%c26_168] : memref<32xf32, #tpu.memory_space<smem>>
    %437 = vector.broadcast %436 : f32 to vector<8x8xf32>
    %438 = arith.mulf %435, %437 : vector<8x8xf32>
    %439 = arith.addf %423, %438 : vector<8x8xf32>
    %c27 = arith.constant 27 : index
    %c0_169 = arith.constant 0 : index
    %440 = memref.load %arg4[%c27, %c0_169] : memref<32x2xf32, #tpu.memory_space<smem>>
    %441 = vector.broadcast %440 : f32 to vector<8x8xf32>
    %442 = arith.mulf %0, %441 : vector<8x8xf32>
    %c27_170 = arith.constant 27 : index
    %c1_171 = arith.constant 1 : index
    %443 = memref.load %arg4[%c27_170, %c1_171] : memref<32x2xf32, #tpu.memory_space<smem>>
    %444 = vector.broadcast %443 : f32 to vector<8x8xf32>
    %445 = arith.mulf %5, %444 : vector<8x8xf32>
    %446 = arith.addf %442, %445 : vector<8x8xf32>
    %c27_172 = arith.constant 27 : index
    %447 = memref.load %arg5[%c27_172] : memref<32xf32, #tpu.memory_space<smem>>
    %448 = vector.broadcast %447 : f32 to vector<8x8xf32>
    %449 = arith.addf %446, %448 : vector<8x8xf32>
    %cst_173 = arith.constant 0.000000e+00 : f32
    %450 = vector.broadcast %cst_173 : f32 to vector<8x8xf32>
    %451 = arith.maximumf %449, %450 : vector<8x8xf32>
    %c27_174 = arith.constant 27 : index
    %452 = memref.load %arg6[%c27_174] : memref<32xf32, #tpu.memory_space<smem>>
    %453 = vector.broadcast %452 : f32 to vector<8x8xf32>
    %454 = arith.mulf %451, %453 : vector<8x8xf32>
    %455 = arith.addf %439, %454 : vector<8x8xf32>
    %c28 = arith.constant 28 : index
    %c0_175 = arith.constant 0 : index
    %456 = memref.load %arg4[%c28, %c0_175] : memref<32x2xf32, #tpu.memory_space<smem>>
    %457 = vector.broadcast %456 : f32 to vector<8x8xf32>
    %458 = arith.mulf %0, %457 : vector<8x8xf32>
    %c28_176 = arith.constant 28 : index
    %c1_177 = arith.constant 1 : index
    %459 = memref.load %arg4[%c28_176, %c1_177] : memref<32x2xf32, #tpu.memory_space<smem>>
    %460 = vector.broadcast %459 : f32 to vector<8x8xf32>
    %461 = arith.mulf %5, %460 : vector<8x8xf32>
    %462 = arith.addf %458, %461 : vector<8x8xf32>
    %c28_178 = arith.constant 28 : index
    %463 = memref.load %arg5[%c28_178] : memref<32xf32, #tpu.memory_space<smem>>
    %464 = vector.broadcast %463 : f32 to vector<8x8xf32>
    %465 = arith.addf %462, %464 : vector<8x8xf32>
    %cst_179 = arith.constant 0.000000e+00 : f32
    %466 = vector.broadcast %cst_179 : f32 to vector<8x8xf32>
    %467 = arith.maximumf %465, %466 : vector<8x8xf32>
    %c28_180 = arith.constant 28 : index
    %468 = memref.load %arg6[%c28_180] : memref<32xf32, #tpu.memory_space<smem>>
    %469 = vector.broadcast %468 : f32 to vector<8x8xf32>
    %470 = arith.mulf %467, %469 : vector<8x8xf32>
    %471 = arith.addf %455, %470 : vector<8x8xf32>
    %c29 = arith.constant 29 : index
    %c0_181 = arith.constant 0 : index
    %472 = memref.load %arg4[%c29, %c0_181] : memref<32x2xf32, #tpu.memory_space<smem>>
    %473 = vector.broadcast %472 : f32 to vector<8x8xf32>
    %474 = arith.mulf %0, %473 : vector<8x8xf32>
    %c29_182 = arith.constant 29 : index
    %c1_183 = arith.constant 1 : index
    %475 = memref.load %arg4[%c29_182, %c1_183] : memref<32x2xf32, #tpu.memory_space<smem>>
    %476 = vector.broadcast %475 : f32 to vector<8x8xf32>
    %477 = arith.mulf %5, %476 : vector<8x8xf32>
    %478 = arith.addf %474, %477 : vector<8x8xf32>
    %c29_184 = arith.constant 29 : index
    %479 = memref.load %arg5[%c29_184] : memref<32xf32, #tpu.memory_space<smem>>
    %480 = vector.broadcast %479 : f32 to vector<8x8xf32>
    %481 = arith.addf %478, %480 : vector<8x8xf32>
    %cst_185 = arith.constant 0.000000e+00 : f32
    %482 = vector.broadcast %cst_185 : f32 to vector<8x8xf32>
    %483 = arith.maximumf %481, %482 : vector<8x8xf32>
    %c29_186 = arith.constant 29 : index
    %484 = memref.load %arg6[%c29_186] : memref<32xf32, #tpu.memory_space<smem>>
    %485 = vector.broadcast %484 : f32 to vector<8x8xf32>
    %486 = arith.mulf %483, %485 : vector<8x8xf32>
    %487 = arith.addf %471, %486 : vector<8x8xf32>
    %c30 = arith.constant 30 : index
    %c0_187 = arith.constant 0 : index
    %488 = memref.load %arg4[%c30, %c0_187] : memref<32x2xf32, #tpu.memory_space<smem>>
    %489 = vector.broadcast %488 : f32 to vector<8x8xf32>
    %490 = arith.mulf %0, %489 : vector<8x8xf32>
    %c30_188 = arith.constant 30 : index
    %c1_189 = arith.constant 1 : index
    %491 = memref.load %arg4[%c30_188, %c1_189] : memref<32x2xf32, #tpu.memory_space<smem>>
    %492 = vector.broadcast %491 : f32 to vector<8x8xf32>
    %493 = arith.mulf %5, %492 : vector<8x8xf32>
    %494 = arith.addf %490, %493 : vector<8x8xf32>
    %c30_190 = arith.constant 30 : index
    %495 = memref.load %arg5[%c30_190] : memref<32xf32, #tpu.memory_space<smem>>
    %496 = vector.broadcast %495 : f32 to vector<8x8xf32>
    %497 = arith.addf %494, %496 : vector<8x8xf32>
    %cst_191 = arith.constant 0.000000e+00 : f32
    %498 = vector.broadcast %cst_191 : f32 to vector<8x8xf32>
    %499 = arith.maximumf %497, %498 : vector<8x8xf32>
    %c30_192 = arith.constant 30 : index
    %500 = memref.load %arg6[%c30_192] : memref<32xf32, #tpu.memory_space<smem>>
    %501 = vector.broadcast %500 : f32 to vector<8x8xf32>
    %502 = arith.mulf %499, %501 : vector<8x8xf32>
    %503 = arith.addf %487, %502 : vector<8x8xf32>
    %c31 = arith.constant 31 : index
    %c0_193 = arith.constant 0 : index
    %504 = memref.load %arg4[%c31, %c0_193] : memref<32x2xf32, #tpu.memory_space<smem>>
    %505 = vector.broadcast %504 : f32 to vector<8x8xf32>
    %506 = arith.mulf %0, %505 : vector<8x8xf32>
    %c31_194 = arith.constant 31 : index
    %c1_195 = arith.constant 1 : index
    %507 = memref.load %arg4[%c31_194, %c1_195] : memref<32x2xf32, #tpu.memory_space<smem>>
    %508 = vector.broadcast %507 : f32 to vector<8x8xf32>
    %509 = arith.mulf %5, %508 : vector<8x8xf32>
    %510 = arith.addf %506, %509 : vector<8x8xf32>
    %c31_196 = arith.constant 31 : index
    %511 = memref.load %arg5[%c31_196] : memref<32xf32, #tpu.memory_space<smem>>
    %512 = vector.broadcast %511 : f32 to vector<8x8xf32>
    %513 = arith.addf %510, %512 : vector<8x8xf32>
    %cst_197 = arith.constant 0.000000e+00 : f32
    %514 = vector.broadcast %cst_197 : f32 to vector<8x8xf32>
    %515 = arith.maximumf %513, %514 : vector<8x8xf32>
    %c31_198 = arith.constant 31 : index
    %516 = memref.load %arg6[%c31_198] : memref<32xf32, #tpu.memory_space<smem>>
    %517 = vector.broadcast %516 : f32 to vector<8x8xf32>
    %518 = arith.mulf %515, %517 : vector<8x8xf32>
    %519 = arith.addf %503, %518 : vector<8x8xf32>
    %520 = arith.negf %519 : vector<8x8xf32>
    %521 = math.exp %520 : vector<8x8xf32>
    %cst_199 = arith.constant 1.000000e+00 : f32
    %522 = vector.broadcast %cst_199 : f32 to vector<8x8xf32>
    %523 = arith.addf %522, %521 : vector<8x8xf32>
    %524 = arith.divf %522, %523 : vector<8x8xf32>
    %525 = arith.mulf %524, %0 : vector<8x8xf32>
    %cst_200 = arith.constant 1.000000e+00 : f32
    %526 = vector.broadcast %cst_200 : f32 to vector<8x8xf32>
    %527 = arith.subf %526, %524 : vector<8x8xf32>
    %528 = arith.mulf %527, %5 : vector<8x8xf32>
    %529 = arith.addf %525, %528 : vector<8x8xf32>
    %cst_201 = arith.constant 0.000000e+00 : f32
    %530 = vector.broadcast %cst_201 : f32 to vector<8x8xf32>
    %531 = arith.cmpf one, %0, %530 : vector<8x8xf32>
    %cst_202 = arith.constant 0.000000e+00 : f32
    %532 = vector.broadcast %cst_202 : f32 to vector<8x8xf32>
    %533 = arith.select %531, %529, %532 : vector<8x8xi1>, vector<8x8xf32>
    %c0_203 = arith.constant 0 : index
    %c0_204 = arith.constant 0 : index
    %534 = vector.load %arg8[%c0_203, %c0_204] : memref<8x8xf32, #tpu.memory_space<vmem>>, vector<8x8xf32>
    tpu.vector_store %arg8[%c0_203, %c0_204], %533 {strides = array<i32>} : memref<8x8xf32, #tpu.memory_space<vmem>>, vector<8x8xf32>,
    return
  }
  func.func @transform_0(%arg0: i32) -> (i32, i32) {
    %c0_i32 = arith.constant 0 : i32
    %c0_i32_0 = arith.constant 0 : i32
    return %arg0, %c0_i32 : i32, i32
  }
  func.func @transform_1(%arg0: i32) -> (i32, i32) {
    %c0_i32 = arith.constant 0 : i32
    %c0_i32_0 = arith.constant 0 : i32
    return %arg0, %c0_i32 : i32, i32
  }
  func.func @transform_2(%arg0: i32) -> (i32, i32) {
    %c0_i32 = arith.constant 0 : i32
    %c0_i32_0 = arith.constant 0 : i32
    %c0_i32_1 = arith.constant 0 : i32
    return %c0_i32, %c0_i32_0 : i32, i32
  }
  func.func @transform_3(%arg0: i32) -> (i32, i32) {
    %c0_i32 = arith.constant 0 : i32
    %c0_i32_0 = arith.constant 0 : i32
    %c0_i32_1 = arith.constant 0 : i32
    return %c0_i32, %c0_i32_0 : i32, i32
  }
  func.func @transform_4(%arg0: i32) -> i32 {
    %c0_i32 = arith.constant 0 : i32
    %c0_i32_0 = arith.constant 0 : i32
    return %c0_i32 : i32
  }
  func.func @transform_5(%arg0: i32) -> i32 {
    %c0_i32 = arith.constant 0 : i32
    %c0_i32_0 = arith.constant 0 : i32
    return %c0_i32 : i32
  }
  func.func @transform_6(%arg0: i32) -> i32 {
    %c0_i32 = arith.constant 0 : i32
    %c0_i32_0 = arith.constant 0 : i32
    return %c0_i32 : i32
  }
  func.func @transform_7(%arg0: i32) -> (i32, i32) {
    %c0_i32 = arith.constant 0 : i32
    %c0_i32_0 = arith.constant 0 : i32
    return %arg0, %c0_i32 : i32, i32
  }
}

</mosaic_0001>

<bundles_post_ra>
// kernel: tpu_custom_call.1
= control target key start
LH: loop header
LB: loop body
LE: loop exit
PB: predicated region body
PF: predicated region fallthrough
CT: control target
= control target key end

     0   :  { %s1606_s0 = inlined_call_operand.vmem [shape: f32[8,8], index: 0, kind: input, shape index: {}]   ;;  %s1607_s1 = inlined_call_operand.vmem [shape: f32[8,32], index: 1, kind: input, shape index: {}]   ;;  %s1608_s2 = inlined_call_operand.vmem [shape: f32[8,32], index: 2, kind: input, shape index: {}]   ;;  %s1609_s3 = inlined_call_operand.vmem [shape: f32[32,2], index: 3, kind: input, shape index: {}]   ;;  %s1610_s4 = inlined_call_operand.vmem [shape: f32[32], index: 4, kind: input, shape index: {}]   ;;  %s1611_s5 = inlined_call_operand.vmem [shape: f32[32], index: 5, kind: input, shape index: {}]   ;;  %s1612_s6 = inlined_call_operand.<no memory space> [shape: f32[1], index: 6, kind: input, shape index: {}]   ;;  %s1613_s7 = inlined_call_operand.hbm [shape: f32[8,8], index: 7, kind: output, shape index: {}]  }
   0x1   :  { %1671 = sst [smem:[#allocation60_spill]] %s1612_s6 }
   0x2   :  { %1672 = sst [smem:[#allocation61_spill]] %s1613_s7 }
   0x3   :  { %13 = vsyncpa [#allocation5], 0 }
   0x4   :  { %14 = vsyncpa [#allocation7], 0  ;;  %s40_s26 = sshll.u32 %s1610_s4, 4  ;;  %s41_s26 = int_to_ptr.vmem [resolvable:$true] %s40_s26 }
   0x5   :  { %15 = vsyncpa [#allocation4], 0  ;;  %s27_s29 = sshll.u32 %s1609_s3, 4  ;;  %s778_s30 = scalar_lea.vmem %s41_s26, 16  ;;  %s28_s29 = int_to_ptr.vmem [resolvable:$true] %s27_s29 }
   0x6   :  { %p779_p0 = scmp.ne.s32.totalorder %s41_s26, %s778_s30  ;;  %p783_p1 = scmp.lt.s32.totalorder %s41_s26, %s41_s26 }
   0x7   :  { %p784_p2 = scmp.lt.s32.totalorder %s778_s30, %s778_s30 }
   0x9   :  { %p785_p3 = por %p784_p2, %p783_p1 }
   0xb   :  { %p786_p4 = pnand %p785_p3, %p779_p0 }
   0xd   :  { %789 = shalt.err (!%p786_p4)
}
   0xe   :  { %s842_s8 = smov [#allocation6]   ;;  %s790_s9 = scalar_lea.vmem %s28_s29, 512 }
   0xf   :  { %43 = dma.vmem_to_smem %s41_s26, 16, %s842_s8, [#allocation7]  }
  0x10   :  { %p791_p5 = scmp.ne.s32.totalorder %s28_s29, %s790_s9  ;;  %p795_p6 = scmp.lt.s32.totalorder %s28_s29, %s28_s29 }
  0x11   :  { %p796_p7 = scmp.lt.s32.totalorder %s790_s9, %s790_s9 }
  0x13   :  { %p797_p8 = por %p796_p7, %p795_p6 }
  0x15   :  { %p798_p9 = pnand %p797_p8, %p791_p5 }
  0x17   :  { %801 = shalt.err (!%p798_p9)
}
  0x18   :  { %s843_s4 = smov [#allocation3]   ;;  %s844_s10 = smov 128  }
  0x19   :  { %s845_s3 = smov 8   ;;  %s50_s13 = sshll.u32 %s1611_s5, 4  ;;  %s51_s13 = int_to_ptr.vmem [resolvable:$true] %s50_s13 }
  0x1a   :  { %33 = dma.vmem_to_smem %s28_s29, 512, %s843_s4, [#allocation5], %s844_s10, %s844_s10, %s845_s3  }
  0x1b   :  { %s802_s14 = scalar_lea.vmem %s51_s13, 16  ;;  %p807_p11 = scmp.lt.s32.totalorder %s51_s13, %s51_s13 }
  0x1c   :  { %p803_p10 = scmp.ne.s32.totalorder %s51_s13, %s802_s14  ;;  %p808_p12 = scmp.lt.s32.totalorder %s802_s14, %s802_s14 }
  0x1e   :  { %p809_p13 = por %p808_p12, %p807_p11 }
  0x20   :  { %p810_p0 = pnand %p809_p13, %p803_p10 }
  0x22   :  { %813 = shalt.err (!%p810_p0)
}
  0x23   :  { %s846_s15 = smov [#allocation8]  }
  0x24   :  { %53 = dma.vmem_to_smem %s51_s13, 16, %s846_s15, [#allocation7]  }
  0x25   :  { %836 = dma.done.wait [#allocation5], 512  }
  0x26   :  { %837 = vsyncadd [#allocation5], 4294966784 }
  0x27   :  { %838 = dma.done.wait [#allocation7], 32  }
  0x28   :  { %839 = vsyncadd [#allocation7], 4294967264 }
  0x29   :  { %65 = sfence }
  0x2a   :  { %v70_v0 = vld [vmem:[%s1608_s2] sm:$0xff]  ;;  %vm72_vm0 = vcmask 261120   ;;  %v847_v1 = vmov 0.0   ;;  %vm848_vm1 = vmmov 0   ;;  %s905_s19 = sld [smem:[#allocation3]]  ;;  %s907_s20 = sld [smem:[#allocation3 + $0x1]]  ;;  %v120_v17 = vstv %s1612_s6 }
  0x2b   :  { %760 = vmatprep.subr.bf16.mxu0 %v847_v1  ;;  %v71_v2 = vpack.c.bf16 %v70_v0, %v70_v0  ;;  %762 = vmatprep.mubr.msk.bf16.mxu0 %vm848_vm1, %v847_v1  ;;  %v68_v4 = vld [vmem:[%s1607_s1] sm:$0xff]  ;;  %s909_s21 = sld [smem:[#allocation3 + $0x80]]  ;;  %s911_s2 = sld [smem:[#allocation3 + $0x81]]  ;;  %vm613_vm3 = vcmask 64512  }
  0x2c   :  { %v69_v5 = vpack.c.bf16 %v68_v4, %v68_v4  ;;  %s913_s22 = sld [smem:[#allocation3 + $0x100]]  ;;  %s915_s23 = sld [smem:[#allocation3 + $0x101]]  ;;  %v984_v6 = vld [vmem:[%s1606_s0] sm:$0xff] }
  0x2d   :  { %v77_v3 = vsel %vm72_vm0, %v71_v2, 0  ;;  %s917_s24 = sld [smem:[#allocation3 + $0x180]]  ;;  %s919_s25 = sld [smem:[#allocation3 + $0x181]]  ;;  %vm611_vm2 = vcmp.ne.f32.partialorder %v984_v6, 0.0 }
  0x2e   :  { %761 = vmatpush3.bf16.xpose.msra.mxu0 %v77_v3  ;;  %s921_s26 = sld [smem:[#allocation6]]  ;;  %s923_s1 = sld [smem:[#allocation6 + $0x1]] }
  0x2f   :  { %s925_s27 = sld [smem:[#allocation6 + $0x2]]  ;;  %s927_s28 = sld [smem:[#allocation6 + $0x3]] }
  0x30   :  { %1673 = sst [smem:[#allocation13_spill]] %s907_s20  ;;  %s931_s30 = sld [smem:[#allocation3 + $0x201]]  ;;  %v122_v7 = vstv %s905_s19  ;;  %v125_v11 = vstv %s907_s20 }
  0x31   :  { %1674 = sst [smem:[#allocation14_spill]] %s911_s2  ;;  %s929_s29 = sld [smem:[#allocation3 + $0x200]]  ;;  %v137_v8 = vstv %s909_s21  ;;  %v1002_v10 = vmul.f32 %v122_v7, %v984_v6  ;;  %v140_v14 = vstv %s911_s2 }
  0x32   :  { %1675 = sst [smem:[#allocation15_spill]] %s915_s23  ;;  %s933_s8 = sld [smem:[#allocation6 + $0x4]]  ;;  %v152_v9 = vstv %s913_s22  ;;  %v1011_v13 = vmul.f32 %v137_v8, %v984_v6  ;;  %v155_v15 = vstv %s915_s23 }
  0x33   :  { %1676 = sst [smem:[#allocation16_spill]] %s919_s25  ;;  %s935_s9 = sld [smem:[#allocation3 + $0x280]]  ;;  %v167_v12 = vstv %s917_s24  ;;  %v1024_v18 = vmul.f32 %v152_v9, %v984_v6  ;;  %v170_v19 = vstv %s919_s25 }
  0x34   :  { %1677 = sst [smem:[#allocation17_spill]] %s921_s26  ;;  %s937_s4 = sld [smem:[#allocation8]]  ;;  %v129_v21 = vstv %s921_s26  ;;  %v144_v22 = vstv %s923_s1  ;;  %v1036_v24 = vmul.f32 %v167_v12, %v984_v6 }
  0x35   :  { %763 = vmatmul.mubr.msk.bf16.vlgmr.msra.gmra.mrb[0].mxu0 %vm72_vm0, %v69_v5  ;;  %1678 = sst [smem:[#allocation18_spill]] %s923_s1  ;;  %s939_s10 = sld [smem:[#allocation8 + $0x1]]  ;;  %v159_v23 = vstv %s925_s27  ;;  %v174_v25 = vstv %s927_s28 }
  0x36   :  { %1679 = sst [smem:[#allocation19_spill]] %s925_s27  ;;  %s941_s3 = sld [smem:[#allocation8 + $0x2]]  ;;  %v185_v27 = vstv %s931_s30 }
  0x37   :  { %1680 = sst [smem:[#allocation20_spill]] %s927_s28  ;;  %s943_s11 = sld [smem:[#allocation8 + $0x3]]  ;;  %v182_v16 = vstv %s929_s29 }
  0x38   :  { %1681 = sst [smem:[#allocation21_spill]] %s931_s30  ;;  %s945_s12 = sld [smem:[#allocation8 + $0x4]]  ;;  %v1044_v26 = vmul.f32 %v182_v16, %v984_v6  ;;  %v189_v28 = vstv %s933_s8 }
  0x39   :  { %1682 = sst [smem:[#allocation22_spill]] %s933_s8  ;;  %s949_s14 = sld [smem:[#allocation6 + $0x5]]  ;;  %v197_v20 = vstv %s935_s9 }
  0x3a   :  { %1683 = sst [smem:[#allocation23_spill]] %s937_s4  ;;  %s947_s13 = sld [smem:[#allocation3 + $0x281]]  ;;  %v133_v29 = vstv %s937_s4  ;;  %v1055_v31 = vmul.f32 %v197_v20, %v984_v6 }
  0x3b   :  { %1684 = sst [smem:[#allocation24_spill]] %s939_s10  ;;  %s951_s15 = sld [smem:[#allocation8 + $0x5]]  ;;  %v148_v30 = vstv %s939_s10 }
  0x3c   :  { %1685 = sst [smem:[#allocation25_spill]] %s941_s3  ;;  %s953_s16 = sld [smem:[#allocation3 + $0x300]] }
  0x3d   :  { %1686 = sst [smem:[#allocation26_spill]] %s943_s11  ;;  %s955_s17 = sld [smem:[#allocation3 + $0x301]] }
  0x3e   :  { %1687 = sst [smem:[#allocation27_spill]] %s945_s12  ;;  %s961_s7 = sld [smem:[#allocation3 + $0x380]] }
  0x3f   :  { %1689 = sst [smem:[#allocation29_spill]] %s949_s14  ;;  %s957_s5 = sld [smem:[#allocation6 + $0x6]] }
  0x40   :  { %1688 = sst [smem:[#allocation28_spill]] %s947_s13  ;;  %s959_s18 = sld [smem:[#allocation8 + $0x6]] }
  0x41   :  { %1690 = sst [smem:[#allocation30_spill]] %s951_s15  ;;  %s965_s13 = sld [smem:[#allocation6 + $0x7]] }
  0x42   :  { %s963_s11 = sld [smem:[#allocation3 + $0x381]]  ;;  %s967_s14 = sld [smem:[#allocation8 + $0x7]]  ;;  %v212_v32 = vstv %s953_s16 }
  0x43   :  { %1691 = sst [smem:[#allocation31_spill]] %s955_s17  ;;  %s969_s15 = sld [smem:[#allocation3 + $0x400]]  ;;  %v1079_v41 = vmul.f32 %v212_v32, %v984_v6 }
  0x44   :  { %1694 = sst [smem:[#allocation34_spill]] %s961_s7  ;;  %s971_s12 = sld [smem:[#allocation3 + $0x401]] }
  0x45   :  { %1692 = sst [smem:[#allocation32_spill]] %s957_s5  ;;  %s973_s17 = sld [smem:[#allocation6 + $0x8]] }
  0x46   :  { %1693 = sst [smem:[#allocation33_spill]] %s959_s18  ;;  %s975_s5 = sld [smem:[#allocation3 + $0x480]] }
  0x47   :  { %1696 = sst [smem:[#allocation36_spill]] %s965_s13  ;;  %s977_s18 = sld [smem:[#allocation8 + $0x8]] }
  0x48   :  { %1695 = sst [smem:[#allocation35_spill]] %s963_s11  ;;  %s979_s7 = sld [smem:[#allocation3 + $0x481]] }
  0x49   :  { %1697 = sst [smem:[#allocation37_spill]] %s967_s14  ;;  %s987_s14 = sld [smem:[#allocation6 + $0x9]]  ;;  %v242_v40 = vstv %s969_s15 }
  0x4a   :  { %1698 = sst [smem:[#allocation38_spill]] %s971_s12  ;;  %s999_s0 = sld [smem:[#allocation8 + $0xa]]  ;;  %v1100_v50 = vmul.f32 %v242_v40, %v984_v6 }
  0x4b   :  { %1699 = sst [smem:[#allocation39_spill]] %s973_s17  ;;  %s989_s12 = sld [smem:[#allocation8 + $0x9]] }
  0x4c   :  { %s992_s17 = sld [smem:[#allocation3 + $0x500]]  ;;  %s994_s13 = sld [smem:[#allocation3 + $0x501]]  ;;  %v257_v44 = vstv %s975_s5 }
  0x4d   :  { %1700 = sst [smem:[#allocation40_spill]] %s977_s18  ;;  %s1006_s19 = sld [smem:[#allocation3 + $0x580]]  ;;  %v1111_v55 = vmul.f32 %v257_v44, %v984_v6 }
  0x4e   :  { %1701 = sst [smem:[#allocation41_spill]] %s979_s7  ;;  %s997_s7 = sld [smem:[#allocation6 + $0xa]] }
  0x4f   :  { %1702 = sst [smem:[#allocation42_spill]] %s987_s14  ;;  %s1008_s21 = sld [smem:[#allocation3 + $0x581]]  ;;  %v264_v58 = vstv %s987_s14 }
  0x50   :  { %1705 = sst [smem:[#allocation45_spill]] %s999_s0  ;;  %s1016_s22 = sld [smem:[#allocation6 + $0xb]] }
  0x51   :  { %1703 = sst [smem:[#allocation43_spill]] %s989_s12  ;;  %s1018_s3 = sld [smem:[#allocation8 + $0xb]] }
  0x52   :  { %1704 = sst [smem:[#allocation44_spill]] %s994_s13  ;;  %s1028_s23 = sld [smem:[#allocation3 + $0x600]]  ;;  %v272_v52 = vstv %s992_s17  ;;  %v275_v62 = vstv %s994_s13 }
  0x53   :  { %s1030_s29 = sld [smem:[#allocation3 + $0x601]]  ;;  %s1708_s2 = sld [smem:[#allocation25_spill]]  ;;  %v287_v56 = vstv %s1006_s19  ;;  %v1127_v61 = vmul.f32 %v272_v52, %v984_v6 }
  0x54   :  { %s1709_s11 = sld [smem:[#allocation26_spill]]  ;;  %s1038_s24 = sld [smem:[#allocation6 + $0xc]]  ;;  %v1137_v1 = vmul.f32 %v287_v56, %v984_v6 }
  0x55   :  { %s1711_s6 = sld [smem:[#allocation27_spill]]  ;;  %s1040_s25 = sld [smem:[#allocation8 + $0xc]]  ;;  %v290_v2 = vstv %s1008_s21 }
  0x56   :  { %s1713_s9 = sld [smem:[#allocation34_spill]]  ;;  %s1714_s20 = sld [smem:[#allocation28_spill]] }
  0x57   :  { %1706 = sst [smem:[#allocation46_spill]] %s1018_s3  ;;  %s1715_s1 = sld [smem:[#allocation29_spill]] }
  0x58   :  { %s1048_s27 = sld [smem:[#allocation3 + $0x680]]  ;;  %s1717_s26 = sld [smem:[#allocation30_spill]]  ;;  %v302_v60 = vstv %s1028_s23 }
  0x59   :  { %1707 = sst [smem:[#allocation47_spill]] %s1030_s29  ;;  %s1050_s29 = sld [smem:[#allocation3 + $0x681]]  ;;  %v163_v33 = vstv %s1708_s2  ;;  %v1148_v7 = vmul.f32 %v302_v60, %v984_v6 }
  0x5a   :  { %1710 = sst [smem:[#allocation48_spill]] %s1038_s24  ;;  %s1719_s28 = sld [smem:[#allocation31_spill]]  ;;  %v178_v34 = vstv %s1709_s11 }
  0x5b   :  { %1712 = sst [smem:[#allocation49_spill]] %s1040_s25  ;;  %s1058_s25 = sld [smem:[#allocation6 + $0xd]]  ;;  %v193_v35 = vstv %s1711_s6 }
  0x5c   :  { %s1721_s24 = sld [smem:[#allocation32_spill]]  ;;  %s1060_s30 = sld [smem:[#allocation8 + $0xd]]  ;;  %v227_v36 = vstv %s1713_s9  ;;  %v200_v37 = vstv %s1714_s20 }
  0x5d   :  { %s1723_s8 = sld [smem:[#allocation33_spill]]  ;;  %s1724_s4 = sld [smem:[#allocation35_spill]]  ;;  %v204_v38 = vstv %s1715_s1  ;;  %v1090_v46 = vmul.f32 %v227_v36, %v984_v6 }
  0x5e   :  { %1716 = sst [smem:[#allocation34_spill]] %s1048_s27  ;;  %s1068_s10 = sld [smem:[#allocation3 + $0x701]]  ;;  %v208_v39 = vstv %s1717_s26 }
  0x5f   :  { %1718 = sst [smem:[#allocation28_spill]] %s1050_s29  ;;  %s1066_s29 = sld [smem:[#allocation3 + $0x700]] }
  0x60   :  { %s1725_s3 = sld [smem:[#allocation36_spill]]  ;;  %s1076_s27 = sld [smem:[#allocation8 + $0xe]]  ;;  %v215_v42 = vstv %s1719_s28 }
  0x61   :  { %1720 = sst [smem:[#allocation50_spill]] %s1058_s25  ;;  %s1074_s25 = sld [smem:[#allocation6 + $0xe]] }
  0x62   :  { %1722 = sst [smem:[#allocation51_spill]] %s1060_s30  ;;  %s1728_s30 = sld [smem:[#allocation38_spill]]  ;;  %v219_v43 = vstv %s1721_s24 }
  0x63   :  { %s1730_s9 = sld [smem:[#allocation39_spill]]  ;;  %s1084_s6 = sld [smem:[#allocation3 + $0x780]]  ;;  %v223_v45 = vstv %s1723_s8  ;;  %v230_v47 = vstv %s1724_s4 }
  0x64   :  { %s1086_s11 = sld [smem:[#allocation3 + $0x781]]  ;;  %s1731_s15 = sld [smem:[#allocation41_spill]]  ;;  %v335_v60 = vstv %s1068_s10 }
  0x65   :  { %s1094_s26 = sld [smem:[#allocation6 + $0xf]]  ;;  %s1096_s2 = sld [smem:[#allocation3 + $0x800]]  ;;  %v332_v9 = vstv %s1066_s29 }
  0x66   :  { %1729 = sst [smem:[#allocation53_spill]] %s1076_s27  ;;  %v234_v48 = vstv %s1725_s3  ;;  %s1104_s5 = sld [smem:[#allocation8 + $0xf]]  ;;  %v1167_v56 = vmul.f32 %v332_v9, %v984_v6 }
  0x67   :  { %1727 = sst [smem:[#allocation52_spill]] %s1074_s25  ;;  %s1106_s8 = sld [smem:[#allocation3 + $0x880]] }
  0x68   :  { %v245_v51 = vstv %s1728_s30  ;;  %s1114_s16 = sld [smem:[#allocation3 + $0x801]]  ;;  %s1116_s3 = sld [smem:[#allocation3 + $0x900]] }
  0x69   :  { %v249_v53 = vstv %s1730_s9  ;;  %s1734_s17 = sld [smem:[#allocation34_spill]]  ;;  %s1122_s30 = sld [smem:[#allocation6 + $0x10]]  ;;  %v347_v32 = vstv %s1084_s6 }
  0x6a   :  { %v260_v57 = vstv %s1731_s15  ;;  %s1737_s9 = sld [smem:[#allocation47_spill]]  ;;  %s1124_s18 = sld [smem:[#allocation8 + $0x10]]  ;;  %v1178_v0 = vmul.f32 %v347_v32, %v984_v6 }
  0x6b   :  { %1732 = sst [smem:[#allocation54_spill]] %s1094_s26  ;;  %s1739_s19 = sld [smem:[#allocation48_spill]]  ;;  %v362_v52 = vstv %s1096_s2 }
  0x6c   :  { %1733 = sst [smem:[#allocation55_spill]] %s1104_s5  ;;  %s1741_s4 = sld [smem:[#allocation28_spill]]  ;;  %v1187_v16 = vmul.f32 %v362_v52, %v984_v6 }
  0x6d   :  { %s1132_s14 = sld [smem:[#allocation3 + $0x881]]  ;;  %s1744_s23 = sld [smem:[#allocation50_spill]]  ;;  %v377_v5 = vstv %s1106_s8 }
  0x6e   :  { %s1134_s12 = sld [smem:[#allocation6 + $0x11]]  ;;  %s1158_s0 = sld [smem:[#allocation3 + $0x980]]  ;;  %v392_v59 = vstv %s1116_s3  ;;  %v1193_v32 = vmul.f32 %v377_v5, %v984_v6 }
  0x6f   :  { %1736 = sst [smem:[#allocation34_spill]] %s1122_s30  ;;  %v317_v4 = vstv %s1734_s17  ;;  %s1142_s28 = sld [smem:[#allocation8 + $0x11]] }
  0x70   :  { %1738 = sst [smem:[#allocation47_spill]] %s1124_s18  ;;  %s1144_s13 = sld [smem:[#allocation3 + $0x901]]  ;;  %v305_v8 = vstv %s1737_s9  ;;  %v1161_v36 = vmul.f32 %v317_v4, %v984_v6  ;;  %v1205_v4 = vmul.f32 %v392_v59, %v984_v6 }
  0x71   :  { %s1156_s17 = sld [smem:[#allocation6 + $0x12]]  ;;  %s1174_s29 = sld [smem:[#allocation3 + $0x981]] }
  0x72   :  { %v320_v20 = vstv %s1741_s4  ;;  %s1172_s6 = sld [smem:[#allocation8 + $0x12]]  ;;  %s1182_s2 = sld [smem:[#allocation3 + $0xa00]] }
  0x73   :  { %1742 = sst [smem:[#allocation48_spill]] %s1132_s14  ;;  %s1208_s18 = sld [smem:[#allocation3 + $0xa01]] }
  0x74   :  { %1743 = sst [smem:[#allocation28_spill]] %s1134_s12  ;;  %s1196_s3 = sld [smem:[#allocation6 + $0x13]] }
  0x75   :  { %1746 = sst [smem:[#allocation50_spill]] %s1142_s28  ;;  %s1198_s25 = sld [smem:[#allocation8 + $0x13]] }
  0x76   :  { %1747 = sst [smem:[#allocation56_spill]] %s1144_s13  ;;  %s1222_s28 = sld [smem:[#allocation6 + $0x14]] }
  0x77   :  { %1748 = sst [smem:[#allocation57_spill]] %s1156_s17  ;;  %s1224_s12 = sld [smem:[#allocation3 + $0xa80]]  ;;  %v410_v63 = vstv %s1174_s29 }
  0x78   :  { %1749 = sst [smem:[#allocation58_spill]] %s1172_s6  ;;  %s1234_s30 = sld [smem:[#allocation8 + $0x14]] }
  0x79   :  { %1750 = sst [smem:[#allocation59_spill]] %s1174_s29  ;;  %s1264_s5 = sld [smem:[#allocation6 + $0x15]] }
  0x7a   :  { %1755 = sst [smem:[#allocation13_spill]] %s1196_s3  ;;  %s1277_s27 = sld [smem:[#allocation8 + $0x15]] }
  0x7b   :  { %1757 = sst [smem:[#allocation14_spill]] %s1198_s25  ;;  %s1266_s15 = sld [smem:[#allocation3 + $0xb00]] }
  0x7c   :  { %1758 = sst [smem:[#allocation15_spill]] %s1208_s18  ;;  %s1279_s17 = sld [smem:[#allocation3 + $0xb01]] }
  0x7d   :  { %s1309_s13 = sld [smem:[#allocation6 + $0x16]]  ;;  %s1326_s24 = sld [smem:[#allocation3 + $0xb81]] }
  0x7e   :  { %s1311_s14 = sld [smem:[#allocation8 + $0x16]]  ;;  %s1353_s8 = sld [smem:[#allocation8 + $0x17]] }
  0x7f   :  { %s1355_s26 = sld [smem:[#allocation3 + $0xc01]]  ;;  %s1782_s4 = sld [smem:[#allocation37_spill]] }
  0x80   :  { %s1785_s10 = sld [smem:[#allocation40_spill]]  ;;  %s1382_s1 = sld [smem:[#allocation3 + $0xc81]] }
  0x81   :  { %s1791_s20 = sld [smem:[#allocation52_spill]]  ;;  %s1424_s21 = sld [smem:[#allocation3 + $0xd80]] }
  0x82   :  { %s1806_s9 = sld [smem:[#allocation49_spill]]  ;;  %s1465_s29 = sld [smem:[#allocation3 + $0xe01]] }
 0x108   :  { %v1200_v40 = vpop.f32.mrb[0].mxu0 }
 0x109   :  { %v764_v5 = vpop.f32.mrb[1].mxu0  ;;  %v126_v44 = vmul.f32 %v125_v11, %v1200_v40  ;;  %v141_v54 = vmul.f32 %v140_v14, %v1200_v40  ;;  %v156_v49 = vmul.f32 %v155_v15, %v1200_v40  ;;  %v171_v9 = vmul.f32 %v170_v19, %v1200_v40 }
 0x10a   :  { %v116_v59 = vpop.f32.mrb[2].mxu0  ;;  %v186_v11 = vmul.f32 %v185_v27, %v1200_v40  ;;  %v201_v14 = vmul.f32 %v200_v37, %v1200_v40  ;;  %v407_v5 = vstv %s1158_s0  ;;  %v216_v37 = vmul.f32 %v215_v42, %v1200_v40  ;;  %s1246_s0 = sld [smem:[#allocation3 + $0xa81]] }
 0x10b   :  { %v765_v19 = vpop.f32.mrb[3].mxu0  ;;  %v127_v52 = vadd.f32 %v126_v44, %v1002_v10  ;;  %v142_v59 = vadd.f32 %v141_v54, %v1011_v13  ;;  %v157_v12 = vadd.f32 %v156_v49, %v1024_v18  ;;  %v172_v27 = vadd.f32 %v171_v9, %v1036_v24 }
 0x10c   :  { %v187_v3 = vadd.f32 %v186_v11, %v1044_v26  ;;  %v403_v15 = vstv %s1172_s6  ;;  %v422_v24 = vstv %s1182_s2  ;;  %v202_v42 = vadd.f32 %v201_v14, %v1055_v31  ;;  %s1380_s2 = sld [smem:[#allocation6 + $0x18]]  ;;  %s1792_s6 = sld [smem:[#allocation56_spill]] }
 0x10d   :  { %v130_v10 = vadd.f32 %v129_v21, %v127_v52  ;;  %v145_v13 = vadd.f32 %v144_v22, %v142_v59  ;;  %v160_v18 = vadd.f32 %v159_v23, %v157_v12  ;;  %v175_v26 = vadd.f32 %v174_v25, %v172_v27 }
 0x10e   :  { %v231_v49 = vmul.f32 %v230_v47, %v1200_v40  ;;  %v1262_v54 = vmul.f32 %v407_v5, %v984_v6  ;;  %v414_v23 = vstv %s1196_s3  ;;  %v418_v25 = vstv %s1198_s25  ;;  %s1336_s3 = sld [smem:[#allocation6 + $0x17]]  ;;  %s1407_s25 = sld [smem:[#allocation3 + $0xd01]] }
 0x10f   :  { %v131_v21 = vmax.f32 %v130_v10, 0.0  ;;  %v146_v22 = vmax.f32 %v145_v13, 0.0  ;;  %v190_v31 = vadd.f32 %v189_v28, %v187_v3  ;;  %v217_v47 = vadd.f32 %v216_v37, %v1079_v41 }
 0x110   :  { %v1274_v12 = vmul.f32 %v422_v24, %v984_v6  ;;  %v425_v44 = vstv %s1208_s18  ;;  %v161_v52 = vmax.f32 %v160_v18, 0.0  ;;  %v429_v11 = vstv %s1222_s28  ;;  %s1289_s18 = sld [smem:[#allocation3 + $0xb80]] }
 0x111   :  { %v134_v9 = vmul.f32 %v133_v29, %v131_v21  ;;  %v437_v28 = vstv %s1224_s12  ;;  %v176_v3 = vmax.f32 %v175_v26, 0.0  ;;  %v205_v41 = vadd.f32 %v204_v38, %v202_v42  ;;  %s1394_s12 = sld [smem:[#allocation3 + $0xd00]] }
 0x112   :  { %v232_v14 = vadd.f32 %v231_v49, %v1090_v46  ;;  %v433_v5 = vstv %s1234_s30  ;;  %v149_v19 = vmul.f32 %v148_v30, %v146_v22  ;;  %v246_v38 = vmul.f32 %v245_v51, %v1200_v40  ;;  %s1565_s30 = sld [smem:[#allocation8 + $0x1b]] }
 0x113   :  { %v135_v29 = vadd.f32 %v134_v9, %v120_v17  ;;  %v261_v46 = vmul.f32 %v260_v57, %v1200_v40  ;;  %v191_v59 = vmax.f32 %v190_v31, 0.0  ;;  %v220_v27 = vadd.f32 %v219_v43, %v217_v47 }
 0x114   :  { %v1306_v37 = vmul.f32 %v437_v28, %v984_v6  ;;  %v440_v10 = vstv %s1246_s0  ;;  %v164_v30 = vmul.f32 %v163_v33, %v161_v52  ;;  %v247_v51 = vadd.f32 %v246_v38, %v1100_v50  ;;  %s1820_s0 = sld [smem:[#allocation55_spill]] }
 0x115   :  { %v150_v17 = vadd.f32 %v149_v19, %v135_v29  ;;  %v276_v57 = vmul.f32 %v275_v62, %v1200_v40  ;;  %v235_v43 = vadd.f32 %v234_v48, %v232_v14  ;;  %v291_v13 = vmul.f32 %v290_v2, %v1200_v40 }
 0x116   :  { %v444_v18 = vstv %s1264_s5  ;;  %v452_v24 = vstv %s1266_s15  ;;  %v179_v33 = vmul.f32 %v178_v34, %v176_v3  ;;  %v206_v50 = vmax.f32 %v205_v41, 0.0  ;;  %s1338_s15 = sld [smem:[#allocation3 + $0xc00]] }
 0x117   :  { %v165_v26 = vadd.f32 %v164_v30, %v150_v17  ;;  %v262_v42 = vadd.f32 %v261_v46, %v1111_v55  ;;  %v221_v62 = vmax.f32 %v220_v27, 0.0  ;;  %v306_v48 = vmul.f32 %v305_v8, %v1200_v40 }
 0x118   :  { %v448_v49 = vstv %s1277_s27  ;;  %v455_v2 = vstv %s1279_s17  ;;  %v194_v34 = vmul.f32 %v193_v35, %v191_v59  ;;  %v250_v55 = vadd.f32 %v249_v53, %v247_v51  ;;  %s1824_s17 = sld [smem:[#allocation50_spill]]  ;;  %s1575_s27 = sld [smem:[#allocation8 + $0x1c]] }
 0x119   :  { %v180_v21 = vadd.f32 %v179_v33, %v165_v26  ;;  %v277_v22 = vadd.f32 %v276_v57, %v1127_v61  ;;  %v292_v8 = vadd.f32 %v291_v13, %v1137_v1  ;;  %v321_v31 = vmul.f32 %v320_v20, %v1200_v40 }
 0x11a   :  { %v1350_v47 = vmul.f32 %v452_v24, %v984_v6  ;;  %v467_v9 = vstv %s1289_s18  ;;  %v209_v53 = vmul.f32 %v208_v39, %v206_v50  ;;  %v236_v61 = vmax.f32 %v235_v43, 0.0  ;;  %s1367_s18 = sld [smem:[#allocation3 + $0xc80]] }
 0x11b   :  { %v195_v35 = vadd.f32 %v194_v34, %v180_v21  ;;  %v265_v1 = vadd.f32 %v264_v58, %v262_v42  ;;  %v307_v52 = vadd.f32 %v306_v48, %v1148_v7  ;;  %v336_v20 = vmul.f32 %v335_v60, %v1200_v40 }
 0x11c   :  { %v459_v28 = vstv %s1309_s13  ;;  %v463_v3 = vstv %s1311_s14  ;;  %v224_v14 = vmul.f32 %v223_v45, %v221_v62  ;;  %v251_v39 = vmax.f32 %v250_v55, 0.0  ;;  %s1541_s13 = sld [smem:[#allocation8 + $0x19]]  ;;  %s1583_s14 = sld [smem:[#allocation8 + $0x1d]] }
 0x11d   :  { %v210_v41 = vadd.f32 %v209_v53, %v195_v35  ;;  %v1783_v29 = vstv %s997_s7  ;;  %v1784_v19 = vstv %s1016_s22  ;;  %v322_v38 = vadd.f32 %v321_v31, %v1161_v36  ;;  %s1789_s7 = sld [smem:[#allocation43_spill]]  ;;  %s1790_s22 = sld [smem:[#allocation48_spill]] }
 0x11e   :  { %v280_v58 = vadd.f32 %v1783_v29, %v277_v22  ;;  %v295_v7 = vadd.f32 %v1784_v19, %v292_v8  ;;  %v1377_v60 = vmul.f32 %v467_v9, %v984_v6  ;;  %v470_v46 = vstv %s1326_s24  ;;  %s1514_s24 = sld [smem:[#allocation3 + $0xf01]] }
 0x11f   :  { %v225_v45 = vadd.f32 %v224_v14, %v210_v41  ;;  %v1786_v59 = vstv %s1782_s4  ;;  %v266_v17 = vmax.f32 %v265_v1, 0.0  ;;  %v1787_v30 = vstv %s1086_s11  ;;  %s1796_s11 = sld [smem:[#allocation45_spill]]  ;;  %s1807_s4 = sld [smem:[#allocation34_spill]] }
 0x120   :  { %v239_v27 = vmul.f32 %v1786_v59, %v236_v61  ;;  %v351_v51 = vmul.f32 %v1787_v30, %v1200_v40  ;;  %v1788_v36 = vstv %s1739_s19  ;;  %v337_v43 = vadd.f32 %v336_v20, %v1167_v56  ;;  %s1405_s19 = sld [smem:[#allocation6 + $0x19]] }
 0x121   :  { %v310_v57 = vadd.f32 %v1788_v36, %v307_v52  ;;  %v474_v13 = vstv %s1336_s3  ;;  %v482_v24 = vstv %s1338_s15  ;;  %v1793_v33 = vstv %s1785_s10  ;;  %s1434_s10 = sld [smem:[#allocation6 + $0x1a]]  ;;  %s1501_s15 = sld [smem:[#allocation3 + $0xf00]] }
 0x122   :  { %v240_v26 = vadd.f32 %v239_v27, %v225_v45  ;;  %v254_v50 = vmul.f32 %v1793_v33, %v251_v39  ;;  %v281_v42 = vmax.f32 %v280_v58, 0.0  ;;  %v1794_v62 = vstv %s1114_s16  ;;  %s1802_s16 = sld [smem:[#allocation46_spill]]  ;;  %s1554_s3 = sld [smem:[#allocation8 + $0x1a]] }
 0x123   :  { %v366_v48 = vmul.f32 %v1794_v62, %v1200_v40  ;;  %v296_v21 = vmax.f32 %v295_v7, 0.0  ;;  %v1795_v34 = vstv %s1744_s23  ;;  %v478_v56 = vstv %s1353_s8  ;;  %s1803_s23 = sld [smem:[#allocation54_spill]]  ;;  %s752_s8 = sld [smem:[#allocation8 + $0x1e]] }
 0x124   :  { %v325_v55 = vadd.f32 %v1795_v34, %v322_v38  ;;  %v485_v22 = vstv %s1355_s26  ;;  %v255_v8 = vadd.f32 %v254_v50, %v240_v26  ;;  %v1798_v31 = vstv %s1789_s7  ;;  %s1810_s7 = sld [smem:[#allocation51_spill]]  ;;  %s1524_s26 = sld [smem:[#allocation3 + $0xf81]] }
 0x125   :  { %v269_v9 = vmul.f32 %v1798_v31, %v266_v17  ;;  %v352_v35 = vadd.f32 %v351_v51, %v1178_v0  ;;  %v1799_v53 = vstv %s1790_s22  ;;  %v1800_v1 = vstv %s1791_s20  ;;  %s1812_s22 = sld [smem:[#allocation57_spill]]  ;;  %s1451_s20 = sld [smem:[#allocation3 + $0xe00]] }
 0x126   :  { %v381_v61 = vmul.f32 %v1799_v53, %v1200_v40  ;;  %v340_v52 = vadd.f32 %v1800_v1, %v337_v43  ;;  %v1801_v20 = vstv %s1792_s6  ;;  %v1421_v14 = vmul.f32 %v482_v24, %v984_v6  ;;  %s1815_s6 = sld [smem:[#allocation53_spill]] }
 0x127   :  { %v396_v41 = vmul.f32 %v1801_v20, %v1200_v40  ;;  %v497_v39 = vstv %s1367_s18  ;;  %v270_v29 = vadd.f32 %v269_v9, %v255_v8  ;;  %v1805_v58 = vstv %s1796_s11  ;;  %s1436_s18 = sld [smem:[#allocation3 + $0xd81]]  ;;  %s1463_s11 = sld [smem:[#allocation6 + $0x1b]] }
 0x128   :  { %v284_v0 = vmul.f32 %v1805_v58, %v281_v42  ;;  %v311_v19 = vmax.f32 %v310_v57, 0.0  ;;  %v367_v7 = vadd.f32 %v366_v48, %v1187_v16  ;;  %v326_v38 = vmax.f32 %v325_v55, 0.0 }
 0x129   :  { %v411_v45 = vmul.f32 %v410_v63, %v1200_v40  ;;  %v489_v59 = vstv %s1380_s2  ;;  %v500_v27 = vstv %s1382_s1  ;;  %v1808_v30 = vstv %s1802_s16  ;;  %s1811_s1 = sld [smem:[#allocation28_spill]]  ;;  %s1822_s16 = sld [smem:[#allocation47_spill]] }
 0x12a   :  { %v285_v17 = vadd.f32 %v284_v0, %v270_v29  ;;  %v299_v51 = vmul.f32 %v1808_v30, %v296_v21  ;;  %v1809_v36 = vstv %s1803_s23  ;;  %v382_v57 = vadd.f32 %v381_v61, %v1193_v32  ;;  %s1488_s23 = sld [smem:[#allocation6 + $0x1c]]  ;;  %s1569_s2 = sld [smem:[#allocation6 + $0x1f]] }
 0x12b   :  { %v355_v16 = vadd.f32 %v1809_v36, %v352_v35  ;;  %v397_v43 = vadd.f32 %v396_v41, %v1205_v4  ;;  %v426_v63 = vmul.f32 %v425_v44, %v1200_v40  ;;  %v1448_v24 = vmul.f32 %v497_v39, %v984_v6 }
 0x12c   :  { %v512_v26 = vstv %s1394_s12  ;;  %v300_v33 = vadd.f32 %v299_v51, %v285_v17  ;;  %v1813_v50 = vstv %s1806_s9  ;;  %v341_v62 = vmax.f32 %v340_v52, 0.0  ;;  %s1516_s9 = sld [smem:[#allocation3 + $0xf80]] }
 0x12d   :  { %v314_v42 = vmul.f32 %v1813_v50, %v311_v19  ;;  %v1814_v32 = vstv %s1807_s4  ;;  %v412_v4 = vadd.f32 %v411_v45, %v1262_v54  ;;  %v441_v44 = vmul.f32 %v440_v10, %v1200_v40  ;;  %s1531_s4 = sld [smem:[#allocation8 + $0x18]] }
 0x12e   :  { %v370_v48 = vadd.f32 %v1814_v32, %v367_v7  ;;  %v504_v21 = vstv %s1405_s19  ;;  %v515_v34 = vstv %s1407_s25  ;;  %v1817_v8 = vstv %s1810_s7  ;;  %s1476_s25 = sld [smem:[#allocation3 + $0xe80]]  ;;  %s1557_s7 = sld [smem:[#allocation6 + $0x1e]] }
 0x12f   :  { %v315_v55 = vadd.f32 %v314_v42, %v300_v33  ;;  %v329_v31 = vmul.f32 %v1817_v8, %v326_v38  ;;  %v356_v9 = vmax.f32 %v355_v16, 0.0  ;;  %v1818_v35 = vstv %s1811_s1  ;;  %s756_s19 = sld [smem:[#allocation8 + $0x1f]] }
 0x130   :  { %v385_v54 = vadd.f32 %v1818_v35, %v382_v57  ;;  %v1819_v53 = vstv %s1812_s22  ;;  %v427_v10 = vadd.f32 %v426_v63, %v1274_v12  ;;  %v513_v1 = vmul.f32 %v512_v26, %v984_v6 }
 0x131   :  { %v400_v61 = vadd.f32 %v1819_v53, %v397_v43  ;;  %v527_v52 = vstv %s1424_s21  ;;  %v330_v20 = vadd.f32 %v329_v31, %v315_v55  ;;  %v1821_v41 = vstv %s1815_s6  ;;  %s1490_s21 = sld [smem:[#allocation3 + $0xe81]] }
 0x132   :  { %v344_v39 = vmul.f32 %v1821_v41, %v341_v62  ;;  %v371_v29 = vmax.f32 %v370_v48, 0.0  ;;  %v456_v58 = vmul.f32 %v455_v2, %v1200_v40  ;;  %v415_v0 = vadd.f32 %v414_v23, %v412_v4 }
 0x133   :  { %v442_v12 = vadd.f32 %v441_v44, %v1306_v37  ;;  %v519_v19 = vstv %s1434_s10  ;;  %v530_v7 = vstv %s1436_s18  ;;  %v1823_v45 = vstv %s1820_s0  ;;  %s1545_s18 = sld [smem:[#allocation6 + $0x1d]]  ;;  %s849_s10 = smov [#allocation9]  }
 0x134   :  { %v345_v38 = vadd.f32 %v344_v39, %v330_v20  ;;  %v359_v17 = vmul.f32 %v1823_v45, %v356_v9  ;;  %v386_v30 = vmax.f32 %v385_v54, 0.0  ;;  %v471_v23 = vmul.f32 %v470_v46, %v1200_v40  ;;  %s621_s1 = sshll.u32 %s849_s10, 4  ;;  %s622_s1 = int_to_ptr.vmem [resolvable:$true] %s621_s1 }
 0x135   :  { %v401_v2 = vmax.f32 %v400_v61, 0.0  ;;  %v430_v37 = vadd.f32 %v429_v11, %v427_v10  ;;  %v528_v51 = vmul.f32 %v527_v52, %v984_v6  ;;  %v542_v36 = vstv %s1451_s20  ;;  %s814_s22 = scalar_lea.vmem %s622_s1, 128  ;;  %p819_p2 = scmp.lt.s32.totalorder %s622_s1, %s622_s1 }
 0x136   :  { %v360_v16 = vadd.f32 %v359_v17, %v345_v38  ;;  %v1825_v57 = vstv %s1822_s16  ;;  %v457_v63 = vadd.f32 %v456_v58, %v1350_v47  ;;  %v486_v26 = vmul.f32 %v485_v22, %v1200_v40  ;;  %p815_p1 = scmp.ne.s32.totalorder %s622_s1, %s814_s22  ;;  %p820_p3 = scmp.lt.s32.totalorder %s814_s22, %s814_s22 }
 0x137   :  { %v374_v43 = vmul.f32 %v1825_v57, %v371_v29  ;;  %v445_v46 = vadd.f32 %v444_v18, %v442_v12  ;;  %v501_v33 = vmul.f32 %v500_v27, %v1200_v40  ;;  %v534_v11 = vstv %s1463_s11 }
 0x138   :  { %v545_v50 = vstv %s1465_s29  ;;  %v1827_v62 = vstv %s1824_s17  ;;  %v416_v47 = vmax.f32 %v415_v0, 0.0  ;;  %v472_v22 = vadd.f32 %v471_v23, %v1377_v60  ;;  %p821_p4 = por %p820_p3, %p819_p2 }
 0x139   :  { %v375_v42 = vadd.f32 %v374_v43, %v360_v16  ;;  %v389_v32 = vmul.f32 %v1827_v62, %v386_v30  ;;  %v431_v18 = vmax.f32 %v430_v37, 0.0  ;;  %v516_v48 = vmul.f32 %v515_v34, %v1200_v40 }
 0x13a   :  { %v543_v27 = vmul.f32 %v542_v36, %v984_v6  ;;  %v557_v4 = vstv %s1476_s25  ;;  %v404_v55 = vmul.f32 %v403_v15, %v401_v2  ;;  %v460_v8 = vadd.f32 %v459_v28, %v457_v63  ;;  %p822_p5 = pnand %p821_p4, %p815_p1 }
 0x13b   :  { %v390_v44 = vadd.f32 %v389_v32, %v375_v42  ;;  %v487_v31 = vadd.f32 %v486_v26, %v1421_v14  ;;  %v502_v60 = vadd.f32 %v501_v33, %v1448_v24  ;;  %v531_v34 = vmul.f32 %v530_v7, %v1200_v40 }
 0x13c   :  { %v549_v9 = vstv %s1488_s23  ;;  %v560_v35 = vstv %s1490_s21  ;;  %v419_v53 = vmul.f32 %v418_v25, %v416_v47  ;;  %v446_v15 = vmax.f32 %v445_v46, 0.0 }
 0x13d   :  { %v405_v54 = vadd.f32 %v404_v55, %v390_v44  ;;  %v475_v28 = vadd.f32 %v474_v13, %v472_v22  ;;  %v517_v14 = vadd.f32 %v516_v48, %v513_v1  ;;  %v546_v24 = vmul.f32 %v545_v50, %v1200_v40 }
 0x13e   :  { %v558_v61 = vmul.f32 %v557_v4, %v984_v6  ;;  %v572_v10 = vstv %s1501_s15  ;;  %v434_v25 = vmul.f32 %v433_v5, %v431_v18  ;;  %v461_v20 = vmax.f32 %v460_v8, 0.0 }
 0x13f   :  { %v420_v52 = vadd.f32 %v419_v53, %v405_v54  ;;  %v490_v13 = vadd.f32 %v489_v59, %v487_v31  ;;  %v505_v41 = vadd.f32 %v504_v21, %v502_v60  ;;  %v532_v1 = vadd.f32 %v531_v34, %v528_v51 }
 0x140   :  { %v575_v39 = vstv %s1514_s24  ;;  %v587_v29 = vstv %s1516_s9  ;;  %v449_v0 = vmul.f32 %v448_v49, %v446_v15  ;;  %v476_v12 = vmax.f32 %v475_v28, 0.0 }
 0x141   :  { %v435_v58 = vadd.f32 %v434_v25, %v420_v52  ;;  %v561_v5 = vmul.f32 %v560_v35, %v1200_v40  ;;  %v520_v7 = vadd.f32 %v519_v19, %v517_v14  ;;  %v547_v59 = vadd.f32 %v546_v24, %v543_v27 }
 0x142   :  { %v573_v21 = vmul.f32 %v572_v10, %v984_v6  ;;  %v590_v38 = vstv %s1524_s26  ;;  %v464_v17 = vmul.f32 %v463_v3, %v461_v20  ;;  %v491_v49 = vmax.f32 %v490_v13, 0.0 }
 0x143   :  { %v450_v45 = vadd.f32 %v449_v0, %v435_v58  ;;  %v576_v30 = vmul.f32 %v575_v39, %v1200_v40  ;;  %v493_v23 = vstv %s1531_s4  ;;  %v506_v2 = vmax.f32 %v505_v41, 0.0 }
 0x144   :  { %v535_v19 = vadd.f32 %v534_v11, %v532_v1  ;;  %v588_v37 = vmul.f32 %v587_v29, %v984_v6  ;;  %v479_v36 = vmul.f32 %v478_v56, %v476_v12  ;;  %v562_v16 = vadd.f32 %v561_v5, %v558_v61 }
 0x145   :  { %v465_v51 = vadd.f32 %v464_v17, %v450_v45  ;;  %v591_v57 = vmul.f32 %v590_v38, %v1200_v40  ;;  %v508_v43 = vstv %s1541_s13  ;;  %v550_v3 = vadd.f32 %v549_v9, %v547_v59 }
 0x146   :  { %v564_v63 = vstv %s1545_s18  ;;  %v494_v46 = vmul.f32 %v493_v23, %v491_v49  ;;  %v521_v33 = vmax.f32 %v520_v7, 0.0  ;;  %v577_v11 = vadd.f32 %v576_v30, %v573_v21 }
 0x147   :  { %v480_v26 = vadd.f32 %v479_v36, %v465_v51  ;;  %v523_v50 = vstv %s1554_s3  ;;  %v536_v42 = vmax.f32 %v535_v19, 0.0  ;;  %v579_v62 = vstv %s1557_s7 }
 0x148   :  { %v509_v32 = vmul.f32 %v508_v43, %v506_v2  ;;  %v565_v47 = vadd.f32 %v564_v63, %v562_v16  ;;  %v592_v22 = vadd.f32 %v591_v57, %v588_v37  ;;  %v538_v18 = vstv %s1565_s30 }
 0x149   :  { %v495_v56 = vadd.f32 %v494_v46, %v480_v26  ;;  %v594_v48 = vstv %s1569_s2  ;;  %v524_v4 = vmul.f32 %v523_v50, %v521_v33  ;;  %v551_v44 = vmax.f32 %v550_v3, 0.0 }
 0x14a   :  { %v580_v55 = vadd.f32 %v579_v62, %v577_v11  ;;  %v553_v8 = vstv %s1575_s27  ;;  %v539_v60 = vmul.f32 %v538_v18, %v536_v42  ;;  %v566_v34 = vmax.f32 %v565_v47, 0.0 }
 0x14b   :  { %v510_v27 = vadd.f32 %v509_v32, %v495_v56  ;;  %v595_v9 = vadd.f32 %v594_v48, %v592_v22  ;;  %v568_v35 = vstv %s1583_s14  ;;  %v554_v53 = vmul.f32 %v553_v8, %v551_v44 }
 0x14c   :  { %v581_v15 = vmax.f32 %v580_v55, 0.0  ;;  %v583_v28 = vstv %s752_s8  ;;  %v569_v24 = vmul.f32 %v568_v35, %v566_v34  ;;  %v598_v10 = vstv %s756_s19 }
 0x14d   :  { %v525_v31 = vadd.f32 %v524_v4, %v510_v27  ;;  %v596_v61 = vmax.f32 %v595_v9, 0.0 }
 0x14e   :  { %v584_v25 = vmul.f32 %v583_v28, %v581_v15 }
 0x14f   :  { %v540_v54 = vadd.f32 %v539_v60, %v525_v31  ;;  %v599_v13 = vmul.f32 %v598_v10, %v596_v61 }
 0x151   :  { %v555_v14 = vadd.f32 %v554_v53, %v540_v54 }
 0x153   :  { %v570_v52 = vadd.f32 %v569_v24, %v555_v14 }
 0x155   :  { %v585_v20 = vadd.f32 %v584_v25, %v570_v52 }
 0x157   :  { %v600_v41 = vadd.f32 %v599_v13, %v585_v20 }
 0x159   :  { %v757_v1 = vmul.f32 -1.442695, %v600_v41 }
 0x15b   :  { %774 = vpow2.f32 %v757_v1 }
 0x165   :  { %v775_v39 = vpop.eup %774 }
 0x166   :  { %v604_v29 = vadd.f32 1.0, %v775_v39 }
 0x168   :  { %776 = vrcp.f32 %v604_v29 }
 0x172   :  { %v777_v58 = vpop.eup %776 }
 0x173   :  { %v608_v0 = vsub.f32 1.0, %v777_v58  ;;  %v607_v12 = vmul.f32 %v777_v58, %v984_v6 }
 0x175   :  { %v609_v5 = vmul.f32 %v608_v0, %v1200_v40 }
 0x177   :  { %v610_v7 = vadd.f32 %v609_v5, %v607_v12 }
 0x179   :  { %v612_v59 = vsel %vm611_vm2, %v610_v7, 0.0 }
 0x17a   :  { %614 = vst.msk [vmem:[#allocation9] sm:$0xff] %vm613_vm3, %v612_v59 }
 0x17b   :  { %825 = shalt.err (!%p822_p5)
}
 0x17c   :  { %s1829_s12 = sld [smem:[#allocation61_spill]] }
 0x182   :  { %s826_s11 = scalar_lea.hbm %s1829_s12, 128 }
 0x183   :  { %p827_p6 = scmp.ne.s32.totalorder %s1829_s12, %s826_s11  ;;  %p830_p7 = scmp.lt.u32.totalorder %s826_s11, %s1829_s12 }
 0x185   :  { %p832_p8 = pnand %p830_p7, %p827_p6 }
 0x187   :  { %835 = shalt.err (!%p832_p8)
}
 0x188   :  { %624 = dma.vmem_to_hbm [thread:$0]  %s622_s1, 128, %s1829_s12, [#allocation4]  }
 0x189   :  { %840 = dma.done.wait [#allocation4], 128  }
 0x18a   :  { %841 = vsyncadd [#allocation4], 4294967168 }
 0x18b   :  { %628 = vsyncpa [#allocation4], 1 }
 0x18c   :  { %629 = vsyncpa [#allocation5], 1 }
 0x18d   :  { %630 = vsyncpa [#allocation7], 1 }

</bundles_post_ra>
